<compile_context>
chip_gen: v6e
topology: v6e:2x2x1
jax: 0.10.0
libtpu: 0.0.40
codegen_flags: <defaults>
</compile_context>

<pallas_src>
import functools

import jax
import jax.numpy as jnp
from jax import lax
from jax.experimental import pallas as pl
from jax.experimental.pallas import tpu as pltpu

BN_EPS = 1e-5     # PyTorch BatchNorm2d default
LANE = 128        # TPU lane width


# --------------------------------------------------------------------------
# Kernel A: 3x3 conv (block 1) + per-image BN partial statistics.
# --------------------------------------------------------------------------
def _conv1_stats_kernel(xpad_ref, w_ref, a_ref, stats_ref):
    # xpad_ref : (1, H+2, W+2, Cp)  bf16   (spatially pre-padded input tile)
    # w_ref    : (3, 3*Cp, Cp)      bf16   (per-dy im2col weights, resident)
    # a_ref    : (1, H*W, Cp)       f32    (unnormalized conv output)
    # stats_ref: (1, 2, Cp)         f32    (row0 = sum, row1 = sum of squares)
    H = xpad_ref.shape[1] - 2
    W = xpad_ref.shape[2] - 2
    Cin = xpad_ref.shape[3]

    acc = None
    for dy in range(3):                                  # static unroll
        xr = xpad_ref[0, dy:dy + H]                      # (H, W+2, Cin) bf16
        # im2col over dx: contraction depth becomes 3*Cin (deeper MXU K).
        patch = jnp.concatenate(
            [xr[:, 0:W], xr[:, 1:W + 1], xr[:, 2:W + 2]], axis=-1)
        patch = patch.reshape(H * W, 3 * Cin)            # bf16 operand
        d = jnp.dot(patch, w_ref[dy], preferred_element_type=jnp.float32)
        acc = d if acc is None else acc + d              # init from first tap

    a_ref[0] = acc
    stats_ref[0] = jnp.concatenate(
        [jnp.sum(acc, axis=0, keepdims=True),
         jnp.sum(acc * acc, axis=0, keepdims=True)], axis=0)


# --------------------------------------------------------------------------
# Kernel B: BN1(+beta1)+ReLU  ->  mid  ->  3x3 conv (block 2) + partial stats.
# --------------------------------------------------------------------------
def _bn1_conv2_kernel(a1_ref, scale_ref, shift_ref, w2_ref,
                      mid_ref, a2_ref, stats_ref, midpad_ref, *,
                      leaky_relu: bool):
    # a1_ref   : (1, H*W, Cp) f32     scale/shift_ref: (1, Cp) f32 (resident)
    # w2_ref   : (3, 3*Cp, Cp) bf16   mid_ref/a2_ref : (1, H*W, Cp) f32
    # stats_ref: (1, 2, Cp) f32       midpad_ref     : VMEM (H+2, W+2, Cp) bf16
    H = midpad_ref.shape[0] - 2
    W = midpad_ref.shape[1] - 2
    C = midpad_ref.shape[2]

    a1 = a1_ref[0]                                          # (H*W, C) f32
    c1 = a1 * scale_ref[...] + shift_ref[...]               # fused BN + beta
    if leaky_relu:
        mid = jnp.where(c1 > 0, c1, 0.01 * c1)
    else:
        mid = jnp.maximum(c1, 0.0)
    mid_ref[0] = mid

    # Stage mid into the padded scratch: zero ONLY the border strips, write
    # the interior once (no full zero-fill followed by a full overwrite).
    mid_b = mid.astype(jnp.bfloat16).reshape(H, W, C)
    zrow = jnp.zeros((1, W + 2, C), jnp.bfloat16)
    zcol = jnp.zeros((H, 1, C), jnp.bfloat16)
    midpad_ref[0:1, :, :] = zrow
    midpad_ref[H + 1:H + 2, :, :] = zrow
    midpad_ref[1:H + 1, 0:1, :] = zcol
    midpad_ref[1:H + 1, W + 1:W + 2, :] = zcol
    midpad_ref[1:H + 1, 1:W + 1, :] = mid_b

    acc = None
    for dy in range(3):
        xr = midpad_ref[dy:dy + H]                          # (H, W+2, C) bf16
        patch = jnp.concatenate(
            [xr[:, 0:W], xr[:, 1:W + 1], xr[:, 2:W + 2]], axis=-1)
        patch = patch.reshape(H * W, 3 * C)
        d = jnp.dot(patch, w2_ref[dy], preferred_element_type=jnp.float32)
        acc = d if acc is None else acc + d

    a2_ref[0] = acc
    stats_ref[0] = jnp.concatenate(
        [jnp.sum(acc, axis=0, keepdims=True),
         jnp.sum(acc * acc, axis=0, keepdims=True)], axis=0)


# --------------------------------------------------------------------------
# Kernel C: BN2(+beta2) + residual gate (reads the unpadded identity x).
# --------------------------------------------------------------------------
def _bn2_residual_kernel(a2_ref, x_ref, scale_ref, shift_ref, out_ref, *,
                         leaky_relu: bool):
    out2 = a2_ref[0] * scale_ref[...] + shift_ref[...]      # (H*W, Cp)
    ident = x_ref[0]                                        # (H*W, Cp) f32
    neg = (-0.99) * ident if leaky_relu else -ident
    out_ref[0] = jnp.where(ident + out2 > 0, out2, neg)


# --------------------------------------------------------------------------
# Wrapper
# --------------------------------------------------------------------------
def res_block_forward(x_nchw, w1_oihw, beta1, w2_oihw, beta2,
                      leaky_relu: bool = False):
    """ResBlock forward. x_nchw: (N,C,H,W); weights OIHW (C,C,3,3); betas (C,).

    Returns (out_nchw, mid_nchw), matching the PyTorch module's tuple.
    """
    N, C, H, W = x_nchw.shape
    Cout = w1_oihw.shape[0]
    assert C == Cout, "ResBlock residual requires in_channels == out_channels"

    Cp = ((C + LANE - 1) // LANE) * LANE        # lane-dense channel padding

    # ---- layout glue (NCHW -> NHWC, pad channels to Cp, spatial pad) ----
    x = jnp.transpose(x_nchw, (0, 2, 3, 1)).astype(jnp.float32)      # NHWC
    xc = jnp.pad(x, ((0, 0), (0, 0), (0, 0), (0, Cp - C)))
    x_flat = xc.reshape(N, H * W, Cp)                                 # identity (f32)
    xpad = jnp.pad(xc, ((0, 0), (1, 1), (1, 1), (0, 0))).astype(jnp.bfloat16)

    def prep_w(w_oihw):
        # OIHW -> HWIO, pad channels, fold dx into the contraction dim:
        # (3, 3, Cp, Cp) -> (3, 3*Cp, Cp) with row blocks ordered dx=0,1,2.
        w = jnp.transpose(w_oihw, (2, 3, 1, 0)).astype(jnp.float32)
        w = jnp.pad(w, ((0, 0), (0, 0), (0, Cp - C), (0, Cp - C)))
        return w.reshape(3, 3 * Cp, Cp).astype(jnp.bfloat16)

    w1 = prep_w(w1_oihw)
    w2 = prep_w(w2_oihw)
    b1 = jnp.pad(beta1.astype(jnp.float32), (0, Cp - C))
    b2 = jnp.pad(beta2.astype(jnp.float32), (0, Cp - C))

    cparams = pltpu.CompilerParams(
        dimension_semantics=("parallel",),          # megacore sharding on v7x
        vmem_limit_bytes=32 * 1024 * 1024)          # safe on v5e/v6e/v7x

    row_spec = pl.BlockSpec((1, H * W, Cp), lambda n: (n, 0, 0))
    stat_spec = pl.BlockSpec((1, 2, Cp), lambda n: (n, 0, 0))
    vec_spec = pl.BlockSpec((1, Cp), lambda n: (0, 0))              # resident
    w_spec = pl.BlockSpec((3, 3 * Cp, Cp), lambda n: (0, 0, 0))     # resident

    # ---- pass 1: conv1 + partial stats -------------------------------------
    a1, stats1 = pl.pallas_call(
        _conv1_stats_kernel,
        grid=(N,),
        in_specs=[pl.BlockSpec((1, H + 2, W + 2, Cp), lambda n: (n, 0, 0, 0)),
                  w_spec],
        out_specs=(row_spec, stat_spec),
        out_shape=(jax.ShapeDtypeStruct((N, H * W, Cp), jnp.float32),
                   jax.ShapeDtypeStruct((N, 2, Cp), jnp.float32)),
        compiler_params=cparams,
    )(xpad, w1)

    # ---- tiny cross-image BN reduction (O(N*C) glue) ------------------------
    cnt = float(N * H * W)

    def finalize(stats, beta):
        s = jnp.sum(stats[:, 0, :], axis=0)
        ss = jnp.sum(stats[:, 1, :], axis=0)
        mean = s / cnt
        var = jnp.maximum(ss / cnt - mean * mean, 0.0)   # biased variance
        inv = lax.rsqrt(var + BN_EPS)
        return inv.reshape(1, Cp), (beta - mean * inv).reshape(1, Cp)

    scale1, shift1 = finalize(stats1, b1)

    # ---- pass 2: bn1 + relu -> mid -> conv2 + partial stats -----------------
    mid, a2, stats2 = pl.pallas_call(
        functools.partial(_bn1_conv2_kernel, leaky_relu=leaky_relu),
        grid=(N,),
        in_specs=[row_spec, vec_spec, vec_spec, w_spec],
        out_specs=(row_spec, row_spec, stat_spec),
        out_shape=(jax.ShapeDtypeStruct((N, H * W, Cp), jnp.float32),
                   jax.ShapeDtypeStruct((N, H * W, Cp), jnp.float32),
                   jax.ShapeDtypeStruct((N, 2, Cp), jnp.float32)),
        scratch_shapes=[pltpu.VMEM((H + 2, W + 2, Cp), jnp.bfloat16)],
        compiler_params=cparams,
    )(a1, scale1, shift1, w2)

    scale2, shift2 = finalize(stats2, b2)

    # ---- pass 3: bn2 + residual gate ----------------------------------------
    out = pl.pallas_call(
        functools.partial(_bn2_residual_kernel, leaky_relu=leaky_relu),
        grid=(N,),
        in_specs=[row_spec, row_spec, vec_spec, vec_spec],
        out_specs=row_spec,
        out_shape=jax.ShapeDtypeStruct((N, H * W, Cp), jnp.float32),
        compiler_params=cparams,
    )(a2, x_flat, scale2, shift2)

    out_nhwc = out.reshape(N, H, W, Cp)[..., :C]
    mid_nhwc = mid.reshape(N, H, W, Cp)[..., :C]
    return (jnp.transpose(out_nhwc, (0, 3, 1, 2)),
            jnp.transpose(mid_nhwc, (0, 3, 1, 2)))


res_block_forward = jax.jit(res_block_forward, static_argnames=("leaky_relu",))


# ---------------- pure-JAX reference (for correctness check) ----------------
# The reference mirrors the kernel's MXU precision choice (bf16 conv operands,
# f32 accumulation); everything else follows the PyTorch module exactly.
def _reference(x, w1, b1, w2, b2, leaky_relu=False):
    def convblock(inp, w, beta, relu):
        a = lax.conv_general_dilated(
            inp.astype(jnp.bfloat16), w.astype(jnp.bfloat16),
            window_strides=(1, 1), padding="SAME",
            dimension_numbers=("NCHW", "OIHW", "NCHW"),
            preferred_element_type=jnp.float32)
        mean = a.mean(axis=(0, 2, 3), keepdims=True)
        var = ((a - mean) ** 2).mean(axis=(0, 2, 3), keepdims=True)
        c = (a - mean) / jnp.sqrt(var + BN_EPS) + beta.reshape(1, -1, 1, 1)
        if not relu:
            return c
        return jnp.where(c > 0, c, 0.01 * c) if leaky_relu else jnp.maximum(c, 0.0)

    mid = convblock(x, w1, b1, relu=True)
    out = convblock(mid, w2, b2, relu=False)
    neg = -x * 0.99 if leaky_relu else -x
    return jnp.where(x + out > 0, out, neg), mid


def _kaiming_normal_oihw(key, out_c, in_c, k):
    # nn.init.kaiming_normal_(mode='fan_out', nonlinearity='relu')
    fan_out = out_c * k * k
    std = (2.0 / fan_out) ** 0.5
    return std * jax.random.normal(key, (out_c, in_c, k, k), jnp.float32)


if __name__ == "__main__":
    key = jax.random.PRNGKey(0)
    k_x, k_w1, k_w2, k_b1, k_b2 = jax.random.split(key, 5)

    N, C, H, W = 2, 8, 8, 8
    x = jax.random.normal(k_x, (N, C, H, W), jnp.float32)
    w1 = _kaiming_normal_oihw(k_w1, C, C, 3)
    w2 = _kaiming_normal_oihw(k_w2, C, C, 3)
    # Module __init__ sets beta to zeros; use small random values so the
    # beta-add path is exercised numerically.
    beta1 = 0.1 * jax.random.normal(k_b1, (C,), jnp.float32)
    beta2 = 0.1 * jax.random.normal(k_b2, (C,), jnp.float32)

    out, mid = res_block_forward(x, w1, beta1, w2, beta2, leaky_relu=False)
    jax.block_until_ready((out, mid))

    ref_out, ref_mid = _reference(x, w1, beta1, w2, beta2, leaky_relu=False)
    assert jnp.allclose(mid, ref_mid, atol=1e-2, rtol=1e-2), "mid mismatch"
    assert jnp.allclose(out, ref_out, atol=1e-2, rtol=1e-2), "out mismatch"
    print("KERNEL_OK")
</pallas_src>

<mosaic_0001>
module attributes {stable_mosaic.version = 11 : i64} {
  func.func @_conv1_stats_kernel(%arg0: i32, %arg1: memref<1x10x10x128xbf16, #tpu.memory_space<vmem>>, %arg2: memref<3x384x128xbf16, #tpu.memory_space<vmem>>, %arg3: memref<1x64x128xf32, #tpu.memory_space<vmem>>, %arg4: memref<1x2x128xf32, #tpu.memory_space<vmem>>) attributes {dimension_semantics = [#tpu.dimension_semantics<parallel>], iteration_bounds = array<i64: 2>, scalar_prefetch = 0 : i64, scratch_operands = 0 : i64, tpu.core_type = #tpu.core_type<tc>, window_params = [{transform_indices = @transform_0, window_bounds = array<i64: 1, 10, 10, 128>}, {pipeline_mode = #tpu.pipeline_mode<synchronous>, transform_indices = @transform_1, window_bounds = array<i64: 3, 384, 128>}, {transform_indices = @transform_2, window_bounds = array<i64: 1, 64, 128>}, {transform_indices = @transform_3, window_bounds = array<i64: 1, 2, 128>}]} {
    %c0 = arith.constant 0 : index
    %c0_0 = arith.constant 0 : index
    %c0_1 = arith.constant 0 : index
    %c0_2 = arith.constant 0 : index
    %0 = vector.load %arg1[%c0, %c0_0, %c0_1, %c0_2] : memref<1x10x10x128xbf16, #tpu.memory_space<vmem>>, vector<1x8x10x128xbf16>
    %1 = vector.shape_cast %0 : vector<1x8x10x128xbf16> to vector<8x10x128xbf16>
    %2 = vector.extract_strided_slice %1 {offsets = [0, 0, 0], sizes = [8, 8, 128], strides = [1, 1, 1]} : vector<8x10x128xbf16> to vector<8x8x128xbf16>
    %3 = vector.extract_strided_slice %1 {offsets = [0, 1, 0], sizes = [8, 8, 128], strides = [1, 1, 1]} : vector<8x10x128xbf16> to vector<8x8x128xbf16>
    %4 = vector.extract_strided_slice %1 {offsets = [0, 2, 0], sizes = [8, 8, 128], strides = [1, 1, 1]} : vector<8x10x128xbf16> to vector<8x8x128xbf16>
    %5 = tpu.concatenate %2, %3, %4 in 2 : vector<8x8x128xbf16>, vector<8x8x128xbf16>, vector<8x8x128xbf16> -> vector<8x8x384xbf16>
    %6 = vector.shape_cast %5 : vector<8x8x384xbf16> to vector<64x384xbf16>
    %c0_3 = arith.constant 0 : index
    %c0_4 = arith.constant 0 : index
    %c0_5 = arith.constant 0 : index
    %7 = vector.load %arg2[%c0_3, %c0_4, %c0_5] : memref<3x384x128xbf16, #tpu.memory_space<vmem>>, vector<1x384x128xbf16>
    %8 = vector.shape_cast %7 : vector<1x384x128xbf16> to vector<384x128xbf16>
    %cst = arith.constant dense<0.000000e+00> : vector<64x128xf32>
    %9 = tpu.matmul %6, %8, %cst {dimension_numbers = #tpu.dot_dimension_numbers<[1], [0], [0], [1], [0, 0, 1, 1], [], []>} : vector<64x384xbf16>, vector<384x128xbf16>, vector<64x128xf32> -> vector<64x128xf32>
    %c0_6 = arith.constant 0 : index
    %c1 = arith.constant 1 : index
    %c0_7 = arith.constant 0 : index
    %c0_8 = arith.constant 0 : index
    %10 = vector.load %arg1[%c0_6, %c1, %c0_7, %c0_8] : memref<1x10x10x128xbf16, #tpu.memory_space<vmem>>, vector<1x8x10x128xbf16>
    %11 = vector.shape_cast %10 : vector<1x8x10x128xbf16> to vector<8x10x128xbf16>
    %12 = vector.extract_strided_slice %11 {offsets = [0, 0, 0], sizes = [8, 8, 128], strides = [1, 1, 1]} : vector<8x10x128xbf16> to vector<8x8x128xbf16>
    %13 = vector.extract_strided_slice %11 {offsets = [0, 1, 0], sizes = [8, 8, 128], strides = [1, 1, 1]} : vector<8x10x128xbf16> to vector<8x8x128xbf16>
    %14 = vector.extract_strided_slice %11 {offsets = [0, 2, 0], sizes = [8, 8, 128], strides = [1, 1, 1]} : vector<8x10x128xbf16> to vector<8x8x128xbf16>
    %15 = tpu.concatenate %12, %13, %14 in 2 : vector<8x8x128xbf16>, vector<8x8x128xbf16>, vector<8x8x128xbf16> -> vector<8x8x384xbf16>
    %16 = vector.shape_cast %15 : vector<8x8x384xbf16> to vector<64x384xbf16>
    %c1_9 = arith.constant 1 : index
    %c0_10 = arith.constant 0 : index
    %c0_11 = arith.constant 0 : index
    %17 = vector.load %arg2[%c1_9, %c0_10, %c0_11] : memref<3x384x128xbf16, #tpu.memory_space<vmem>>, vector<1x384x128xbf16>
    %18 = vector.shape_cast %17 : vector<1x384x128xbf16> to vector<384x128xbf16>
    %cst_12 = arith.constant dense<0.000000e+00> : vector<64x128xf32>
    %19 = tpu.matmul %16, %18, %cst_12 {dimension_numbers = #tpu.dot_dimension_numbers<[1], [0], [0], [1], [0, 0, 1, 1], [], []>} : vector<64x384xbf16>, vector<384x128xbf16>, vector<64x128xf32> -> vector<64x128xf32>
    %20 = arith.addf %9, %19 : vector<64x128xf32>
    %c0_13 = arith.constant 0 : index
    %c2 = arith.constant 2 : index
    %c0_14 = arith.constant 0 : index
    %c0_15 = arith.constant 0 : index
    %21 = vector.load %arg1[%c0_13, %c2, %c0_14, %c0_15] : memref<1x10x10x128xbf16, #tpu.memory_space<vmem>>, vector<1x8x10x128xbf16>
    %22 = vector.shape_cast %21 : vector<1x8x10x128xbf16> to vector<8x10x128xbf16>
    %23 = vector.extract_strided_slice %22 {offsets = [0, 0, 0], sizes = [8, 8, 128], strides = [1, 1, 1]} : vector<8x10x128xbf16> to vector<8x8x128xbf16>
    %24 = vector.extract_strided_slice %22 {offsets = [0, 1, 0], sizes = [8, 8, 128], strides = [1, 1, 1]} : vector<8x10x128xbf16> to vector<8x8x128xbf16>
    %25 = vector.extract_strided_slice %22 {offsets = [0, 2, 0], sizes = [8, 8, 128], strides = [1, 1, 1]} : vector<8x10x128xbf16> to vector<8x8x128xbf16>
    %26 = tpu.concatenate %23, %24, %25 in 2 : vector<8x8x128xbf16>, vector<8x8x128xbf16>, vector<8x8x128xbf16> -> vector<8x8x384xbf16>
    %27 = vector.shape_cast %26 : vector<8x8x384xbf16> to vector<64x384xbf16>
    %c2_16 = arith.constant 2 : index
    %c0_17 = arith.constant 0 : index
    %c0_18 = arith.constant 0 : index
    %28 = vector.load %arg2[%c2_16, %c0_17, %c0_18] : memref<3x384x128xbf16, #tpu.memory_space<vmem>>, vector<1x384x128xbf16>
    %29 = vector.shape_cast %28 : vector<1x384x128xbf16> to vector<384x128xbf16>
    %cst_19 = arith.constant dense<0.000000e+00> : vector<64x128xf32>
    %30 = tpu.matmul %27, %29, %cst_19 {dimension_numbers = #tpu.dot_dimension_numbers<[1], [0], [0], [1], [0, 0, 1, 1], [], []>} : vector<64x384xbf16>, vector<384x128xbf16>, vector<64x128xf32> -> vector<64x128xf32>
    %31 = arith.addf %20, %30 : vector<64x128xf32>
    %c0_20 = arith.constant 0 : index
    %c0_21 = arith.constant 0 : index
    %c0_22 = arith.constant 0 : index
    %32 = vector.load %arg3[%c0_20, %c0_21, %c0_22] : memref<1x64x128xf32, #tpu.memory_space<vmem>>, vector<1x64x128xf32>
    %33 = vector.shape_cast %32 : vector<1x64x128xf32> to vector<64x128xf32>
    %34 = vector.shape_cast %31 : vector<64x128xf32> to vector<1x64x128xf32>
    tpu.vector_store %arg3[%c0_20, %c0_21, %c0_22], %34 {strides = array<i32>} : memref<1x64x128xf32, #tpu.memory_space<vmem>>, vector<1x64x128xf32>,
    %cst_23 = arith.constant dense<0.000000e+00> : vector<128xf32>
    %35 = vector.multi_reduction <add>, %31, %cst_23 [0] : vector<64x128xf32> to vector<128xf32>
    %36 = vector.shape_cast %35 : vector<128xf32> to vector<1x128xf32>
    %37 = arith.mulf %31, %31 : vector<64x128xf32>
    %cst_24 = arith.constant dense<0.000000e+00> : vector<128xf32>
    %38 = vector.multi_reduction <add>, %37, %cst_24 [0] : vector<64x128xf32> to vector<128xf32>
    %39 = vector.shape_cast %38 : vector<128xf32> to vector<1x128xf32>
    %40 = tpu.concatenate %36, %39 in 0 : vector<1x128xf32>, vector<1x128xf32> -> vector<2x128xf32>
    %c0_25 = arith.constant 0 : index
    %c0_26 = arith.constant 0 : index
    %c0_27 = arith.constant 0 : index
    %41 = vector.load %arg4[%c0_25, %c0_26, %c0_27] : memref<1x2x128xf32, #tpu.memory_space<vmem>>, vector<1x2x128xf32>
    %42 = vector.shape_cast %41 : vector<1x2x128xf32> to vector<2x128xf32>
    %43 = vector.shape_cast %40 : vector<2x128xf32> to vector<1x2x128xf32>
    tpu.vector_store %arg4[%c0_25, %c0_26, %c0_27], %43 {strides = array<i32>} : memref<1x2x128xf32, #tpu.memory_space<vmem>>, vector<1x2x128xf32>,
    return
  }
  func.func @transform_0(%arg0: i32) -> (i32, i32, i32, i32) {
    %c0_i32 = arith.constant 0 : i32
    %c0_i32_0 = arith.constant 0 : i32
    %c0_i32_1 = arith.constant 0 : i32
    %c0_i32_2 = arith.constant 0 : i32
    return %arg0, %c0_i32, %c0_i32_0, %c0_i32_1 : i32, i32, i32, i32
  }
  func.func @transform_1(%arg0: i32) -> (i32, i32, i32) {
    %c0_i32 = arith.constant 0 : i32
    %c0_i32_0 = arith.constant 0 : i32
    %c0_i32_1 = arith.constant 0 : i32
    %c0_i32_2 = arith.constant 0 : i32
    return %c0_i32, %c0_i32_0, %c0_i32_1 : i32, i32, i32
  }
  func.func @transform_2(%arg0: i32) -> (i32, i32, i32) {
    %c0_i32 = arith.constant 0 : i32
    %c0_i32_0 = arith.constant 0 : i32
    %c0_i32_1 = arith.constant 0 : i32
    return %arg0, %c0_i32, %c0_i32_0 : i32, i32, i32
  }
  func.func @transform_3(%arg0: i32) -> (i32, i32, i32) {
    %c0_i32 = arith.constant 0 : i32
    %c0_i32_0 = arith.constant 0 : i32
    %c0_i32_1 = arith.constant 0 : i32
    return %arg0, %c0_i32, %c0_i32_0 : i32, i32, i32
  }
}

module attributes {stable_mosaic.version = 11 : i64} {
  func.func @_bn2_residual_kernel(%arg0: i32, %arg1: memref<1x64x128xf32, #tpu.memory_space<vmem>>, %arg2: memref<1x64x128xf32, #tpu.memory_space<vmem>>, %arg3: memref<1x128xf32, #tpu.memory_space<vmem>>, %arg4: memref<1x128xf32, #tpu.memory_space<vmem>>, %arg5: memref<1x64x128xf32, #tpu.memory_space<vmem>>) attributes {dimension_semantics = [#tpu.dimension_semantics<parallel>], iteration_bounds = array<i64: 2>, scalar_prefetch = 0 : i64, scratch_operands = 0 : i64, tpu.core_type = #tpu.core_type<tc>, window_params = [{transform_indices = @transform_0, window_bounds = array<i64: 1, 64, 128>}, {transform_indices = @transform_1, window_bounds = array<i64: 1, 64, 128>}, {pipeline_mode = #tpu.pipeline_mode<synchronous>, transform_indices = @transform_2, window_bounds = array<i64: 1, 128>}, {pipeline_mode = #tpu.pipeline_mode<synchronous>, transform_indices = @transform_3, window_bounds = array<i64: 1, 128>}, {transform_indices = @transform_4, window_bounds = array<i64: 1, 64, 128>}]} {
    %c0 = arith.constant 0 : index
    %c0_0 = arith.constant 0 : index
    %c0_1 = arith.constant 0 : index
    %0 = vector.load %arg1[%c0, %c0_0, %c0_1] : memref<1x64x128xf32, #tpu.memory_space<vmem>>, vector<1x64x128xf32>
    %1 = vector.shape_cast %0 : vector<1x64x128xf32> to vector<64x128xf32>
    %c0_2 = arith.constant 0 : index
    %c0_3 = arith.constant 0 : index
    %2 = vector.load %arg3[%c0_2, %c0_3] : memref<1x128xf32, #tpu.memory_space<vmem>>, vector<1x128xf32>
    %3 = vector.broadcast %2 : vector<1x128xf32> to vector<64x128xf32>
    %4 = arith.mulf %1, %3 : vector<64x128xf32>
    %c0_4 = arith.constant 0 : index
    %c0_5 = arith.constant 0 : index
    %5 = vector.load %arg4[%c0_4, %c0_5] : memref<1x128xf32, #tpu.memory_space<vmem>>, vector<1x128xf32>
    %6 = vector.broadcast %5 : vector<1x128xf32> to vector<64x128xf32>
    %7 = arith.addf %4, %6 : vector<64x128xf32>
    %c0_6 = arith.constant 0 : index
    %c0_7 = arith.constant 0 : index
    %c0_8 = arith.constant 0 : index
    %8 = vector.load %arg2[%c0_6, %c0_7, %c0_8] : memref<1x64x128xf32, #tpu.memory_space<vmem>>, vector<1x64x128xf32>
    %9 = vector.shape_cast %8 : vector<1x64x128xf32> to vector<64x128xf32>
    %cst = arith.constant 0.000000e+00 : f32
    %10 = vector.broadcast %cst : f32 to vector<64x128xf32>
    %11 = arith.subf %10, %9 : vector<64x128xf32>
    %12 = arith.addf %9, %7 : vector<64x128xf32>
    %cst_9 = arith.constant 0.000000e+00 : f32
    %13 = vector.broadcast %cst_9 : f32 to vector<64x128xf32>
    %14 = arith.cmpf ogt, %12, %13 : vector<64x128xf32>
    %15 = arith.select %14, %7, %11 : vector<64x128xi1>, vector<64x128xf32>
    %c0_10 = arith.constant 0 : index
    %c0_11 = arith.constant 0 : index
    %c0_12 = arith.constant 0 : index
    %16 = vector.load %arg5[%c0_10, %c0_11, %c0_12] : memref<1x64x128xf32, #tpu.memory_space<vmem>>, vector<1x64x128xf32>
    %17 = vector.shape_cast %16 : vector<1x64x128xf32> to vector<64x128xf32>
    %18 = vector.shape_cast %15 : vector<64x128xf32> to vector<1x64x128xf32>
    tpu.vector_store %arg5[%c0_10, %c0_11, %c0_12], %18 {strides = array<i32>} : memref<1x64x128xf32, #tpu.memory_space<vmem>>, vector<1x64x128xf32>,
    return
  }
  func.func @transform_0(%arg0: i32) -> (i32, i32, i32) {
    %c0_i32 = arith.constant 0 : i32
    %c0_i32_0 = arith.constant 0 : i32
    %c0_i32_1 = arith.constant 0 : i32
    return %arg0, %c0_i32, %c0_i32_0 : i32, i32, i32
  }
  func.func @transform_1(%arg0: i32) -> (i32, i32, i32) {
    %c0_i32 = arith.constant 0 : i32
    %c0_i32_0 = arith.constant 0 : i32
    %c0_i32_1 = arith.constant 0 : i32
    return %arg0, %c0_i32, %c0_i32_0 : i32, i32, i32
  }
  func.func @transform_2(%arg0: i32) -> (i32, i32) {
    %c0_i32 = arith.constant 0 : i32
    %c0_i32_0 = arith.constant 0 : i32
    %c0_i32_1 = arith.constant 0 : i32
    return %c0_i32, %c0_i32_0 : i32, i32
  }
  func.func @transform_3(%arg0: i32) -> (i32, i32) {
    %c0_i32 = arith.constant 0 : i32
    %c0_i32_0 = arith.constant 0 : i32
    %c0_i32_1 = arith.constant 0 : i32
    return %c0_i32, %c0_i32_0 : i32, i32
  }
  func.func @transform_4(%arg0: i32) -> (i32, i32, i32) {
    %c0_i32 = arith.constant 0 : i32
    %c0_i32_0 = arith.constant 0 : i32
    %c0_i32_1 = arith.constant 0 : i32
    return %arg0, %c0_i32, %c0_i32_0 : i32, i32, i32
  }
}

module attributes {stable_mosaic.version = 11 : i64} {
  func.func @_bn1_conv2_kernel(%arg0: i32, %arg1: memref<1x64x128xf32, #tpu.memory_space<vmem>>, %arg2: memref<1x128xf32, #tpu.memory_space<vmem>>, %arg3: memref<1x128xf32, #tpu.memory_space<vmem>>, %arg4: memref<3x384x128xbf16, #tpu.memory_space<vmem>>, %arg5: memref<1x64x128xf32, #tpu.memory_space<vmem>>, %arg6: memref<1x64x128xf32, #tpu.memory_space<vmem>>, %arg7: memref<1x2x128xf32, #tpu.memory_space<vmem>>, %arg8: memref<10x10x128xbf16, #tpu.memory_space<vmem>>) attributes {dimension_semantics = [#tpu.dimension_semantics<parallel>], iteration_bounds = array<i64: 2>, scalar_prefetch = 0 : i64, scratch_operands = 1 : i64, tpu.core_type = #tpu.core_type<tc>, window_params = [{transform_indices = @transform_0, window_bounds = array<i64: 1, 64, 128>}, {pipeline_mode = #tpu.pipeline_mode<synchronous>, transform_indices = @transform_1, window_bounds = array<i64: 1, 128>}, {pipeline_mode = #tpu.pipeline_mode<synchronous>, transform_indices = @transform_2, window_bounds = array<i64: 1, 128>}, {pipeline_mode = #tpu.pipeline_mode<synchronous>, transform_indices = @transform_3, window_bounds = array<i64: 3, 384, 128>}, {transform_indices = @transform_4, window_bounds = array<i64: 1, 64, 128>}, {transform_indices = @transform_5, window_bounds = array<i64: 1, 64, 128>}, {transform_indices = @transform_6, window_bounds = array<i64: 1, 2, 128>}]} {
    %c0 = arith.constant 0 : index
    %c0_0 = arith.constant 0 : index
    %c0_1 = arith.constant 0 : index
    %0 = vector.load %arg1[%c0, %c0_0, %c0_1] : memref<1x64x128xf32, #tpu.memory_space<vmem>>, vector<1x64x128xf32>
    %1 = vector.shape_cast %0 : vector<1x64x128xf32> to vector<64x128xf32>
    %c0_2 = arith.constant 0 : index
    %c0_3 = arith.constant 0 : index
    %2 = vector.load %arg2[%c0_2, %c0_3] : memref<1x128xf32, #tpu.memory_space<vmem>>, vector<1x128xf32>
    %3 = vector.broadcast %2 : vector<1x128xf32> to vector<64x128xf32>
    %4 = arith.mulf %1, %3 : vector<64x128xf32>
    %c0_4 = arith.constant 0 : index
    %c0_5 = arith.constant 0 : index
    %5 = vector.load %arg3[%c0_4, %c0_5] : memref<1x128xf32, #tpu.memory_space<vmem>>, vector<1x128xf32>
    %6 = vector.broadcast %5 : vector<1x128xf32> to vector<64x128xf32>
    %7 = arith.addf %4, %6 : vector<64x128xf32>
    %cst = arith.constant 0.000000e+00 : f32
    %8 = vector.broadcast %cst : f32 to vector<64x128xf32>
    %9 = arith.maximumf %7, %8 : vector<64x128xf32>
    %c0_6 = arith.constant 0 : index
    %c0_7 = arith.constant 0 : index
    %c0_8 = arith.constant 0 : index
    %10 = vector.load %arg5[%c0_6, %c0_7, %c0_8] : memref<1x64x128xf32, #tpu.memory_space<vmem>>, vector<1x64x128xf32>
    %11 = vector.shape_cast %10 : vector<1x64x128xf32> to vector<64x128xf32>
    %12 = vector.shape_cast %9 : vector<64x128xf32> to vector<1x64x128xf32>
    tpu.vector_store %arg5[%c0_6, %c0_7, %c0_8], %12 {strides = array<i32>} : memref<1x64x128xf32, #tpu.memory_space<vmem>>, vector<1x64x128xf32>,
    %13 = arith.truncf %9 : vector<64x128xf32> to vector<64x128xbf16>
    %14 = vector.shape_cast %13 : vector<64x128xbf16> to vector<8x8x128xbf16>
    %cst_9 = arith.constant 0.000000e+00 : bf16
    %15 = vector.broadcast %cst_9 : bf16 to vector<1x10x128xbf16>
    %cst_10 = arith.constant 0.000000e+00 : bf16
    %16 = vector.broadcast %cst_10 : bf16 to vector<8x1x128xbf16>
    %c0_11 = arith.constant 0 : index
    %c0_12 = arith.constant 0 : index
    %c0_13 = arith.constant 0 : index
    %17 = vector.load %arg8[%c0_11, %c0_12, %c0_13] : memref<10x10x128xbf16, #tpu.memory_space<vmem>>, vector<1x10x128xbf16>
    tpu.vector_store %arg8[%c0_11, %c0_12, %c0_13], %15 {strides = array<i32>} : memref<10x10x128xbf16, #tpu.memory_space<vmem>>, vector<1x10x128xbf16>,
    %c9 = arith.constant 9 : index
    %c0_14 = arith.constant 0 : index
    %c0_15 = arith.constant 0 : index
    %18 = vector.load %arg8[%c9, %c0_14, %c0_15] : memref<10x10x128xbf16, #tpu.memory_space<vmem>>, vector<1x10x128xbf16>
    tpu.vector_store %arg8[%c9, %c0_14, %c0_15], %15 {strides = array<i32>} : memref<10x10x128xbf16, #tpu.memory_space<vmem>>, vector<1x10x128xbf16>,
    %c1 = arith.constant 1 : index
    %c0_16 = arith.constant 0 : index
    %c0_17 = arith.constant 0 : index
    %19 = vector.load %arg8[%c1, %c0_16, %c0_17] : memref<10x10x128xbf16, #tpu.memory_space<vmem>>, vector<8x1x128xbf16>
    tpu.vector_store %arg8[%c1, %c0_16, %c0_17], %16 {strides = array<i32>} : memref<10x10x128xbf16, #tpu.memory_space<vmem>>, vector<8x1x128xbf16>,
    %c1_18 = arith.constant 1 : index
    %c9_19 = arith.constant 9 : index
    %c0_20 = arith.constant 0 : index
    %20 = vector.load %arg8[%c1_18, %c9_19, %c0_20] : memref<10x10x128xbf16, #tpu.memory_space<vmem>>, vector<8x1x128xbf16>
    tpu.vector_store %arg8[%c1_18, %c9_19, %c0_20], %16 {strides = array<i32>} : memref<10x10x128xbf16, #tpu.memory_space<vmem>>, vector<8x1x128xbf16>,
    %c1_21 = arith.constant 1 : index
    %c1_22 = arith.constant 1 : index
    %c0_23 = arith.constant 0 : index
    %21 = vector.load %arg8[%c1_21, %c1_22, %c0_23] : memref<10x10x128xbf16, #tpu.memory_space<vmem>>, vector<8x8x128xbf16>
    tpu.vector_store %arg8[%c1_21, %c1_22, %c0_23], %14 {strides = array<i32>} : memref<10x10x128xbf16, #tpu.memory_space<vmem>>, vector<8x8x128xbf16>,
    %c0_24 = arith.constant 0 : index
    %c0_25 = arith.constant 0 : index
    %c0_26 = arith.constant 0 : index
    %22 = vector.load %arg8[%c0_24, %c0_25, %c0_26] : memref<10x10x128xbf16, #tpu.memory_space<vmem>>, vector<8x10x128xbf16>
    %23 = vector.extract_strided_slice %22 {offsets = [0, 0, 0], sizes = [8, 8, 128], strides = [1, 1, 1]} : vector<8x10x128xbf16> to vector<8x8x128xbf16>
    %24 = vector.extract_strided_slice %22 {offsets = [0, 1, 0], sizes = [8, 8, 128], strides = [1, 1, 1]} : vector<8x10x128xbf16> to vector<8x8x128xbf16>
    %25 = vector.extract_strided_slice %22 {offsets = [0, 2, 0], sizes = [8, 8, 128], strides = [1, 1, 1]} : vector<8x10x128xbf16> to vector<8x8x128xbf16>
    %26 = tpu.concatenate %23, %24, %25 in 2 : vector<8x8x128xbf16>, vector<8x8x128xbf16>, vector<8x8x128xbf16> -> vector<8x8x384xbf16>
    %27 = vector.shape_cast %26 : vector<8x8x384xbf16> to vector<64x384xbf16>
    %c0_27 = arith.constant 0 : index
    %c0_28 = arith.constant 0 : index
    %c0_29 = arith.constant 0 : index
    %28 = vector.load %arg4[%c0_27, %c0_28, %c0_29] : memref<3x384x128xbf16, #tpu.memory_space<vmem>>, vector<1x384x128xbf16>
    %29 = vector.shape_cast %28 : vector<1x384x128xbf16> to vector<384x128xbf16>
    %cst_30 = arith.constant dense<0.000000e+00> : vector<64x128xf32>
    %30 = tpu.matmul %27, %29, %cst_30 {dimension_numbers = #tpu.dot_dimension_numbers<[1], [0], [0], [1], [0, 0, 1, 1], [], []>} : vector<64x384xbf16>, vector<384x128xbf16>, vector<64x128xf32> -> vector<64x128xf32>
    %c1_31 = arith.constant 1 : index
    %c0_32 = arith.constant 0 : index
    %c0_33 = arith.constant 0 : index
    %31 = vector.load %arg8[%c1_31, %c0_32, %c0_33] : memref<10x10x128xbf16, #tpu.memory_space<vmem>>, vector<8x10x128xbf16>
    %32 = vector.extract_strided_slice %31 {offsets = [0, 0, 0], sizes = [8, 8, 128], strides = [1, 1, 1]} : vector<8x10x128xbf16> to vector<8x8x128xbf16>
    %33 = vector.extract_strided_slice %31 {offsets = [0, 1, 0], sizes = [8, 8, 128], strides = [1, 1, 1]} : vector<8x10x128xbf16> to vector<8x8x128xbf16>
    %34 = vector.extract_strided_slice %31 {offsets = [0, 2, 0], sizes = [8, 8, 128], strides = [1, 1, 1]} : vector<8x10x128xbf16> to vector<8x8x128xbf16>
    %35 = tpu.concatenate %32, %33, %34 in 2 : vector<8x8x128xbf16>, vector<8x8x128xbf16>, vector<8x8x128xbf16> -> vector<8x8x384xbf16>
    %36 = vector.shape_cast %35 : vector<8x8x384xbf16> to vector<64x384xbf16>
    %c1_34 = arith.constant 1 : index
    %c0_35 = arith.constant 0 : index
    %c0_36 = arith.constant 0 : index
    %37 = vector.load %arg4[%c1_34, %c0_35, %c0_36] : memref<3x384x128xbf16, #tpu.memory_space<vmem>>, vector<1x384x128xbf16>
    %38 = vector.shape_cast %37 : vector<1x384x128xbf16> to vector<384x128xbf16>
    %cst_37 = arith.constant dense<0.000000e+00> : vector<64x128xf32>
    %39 = tpu.matmul %36, %38, %cst_37 {dimension_numbers = #tpu.dot_dimension_numbers<[1], [0], [0], [1], [0, 0, 1, 1], [], []>} : vector<64x384xbf16>, vector<384x128xbf16>, vector<64x128xf32> -> vector<64x128xf32>
    %40 = arith.addf %30, %39 : vector<64x128xf32>
    %c2 = arith.constant 2 : index
    %c0_38 = arith.constant 0 : index
    %c0_39 = arith.constant 0 : index
    %41 = vector.load %arg8[%c2, %c0_38, %c0_39] : memref<10x10x128xbf16, #tpu.memory_space<vmem>>, vector<8x10x128xbf16>
    %42 = vector.extract_strided_slice %41 {offsets = [0, 0, 0], sizes = [8, 8, 128], strides = [1, 1, 1]} : vector<8x10x128xbf16> to vector<8x8x128xbf16>
    %43 = vector.extract_strided_slice %41 {offsets = [0, 1, 0], sizes = [8, 8, 128], strides = [1, 1, 1]} : vector<8x10x128xbf16> to vector<8x8x128xbf16>
    %44 = vector.extract_strided_slice %41 {offsets = [0, 2, 0], sizes = [8, 8, 128], strides = [1, 1, 1]} : vector<8x10x128xbf16> to vector<8x8x128xbf16>
    %45 = tpu.concatenate %42, %43, %44 in 2 : vector<8x8x128xbf16>, vector<8x8x128xbf16>, vector<8x8x128xbf16> -> vector<8x8x384xbf16>
    %46 = vector.shape_cast %45 : vector<8x8x384xbf16> to vector<64x384xbf16>
    %c2_40 = arith.constant 2 : index
    %c0_41 = arith.constant 0 : index
    %c0_42 = arith.constant 0 : index
    %47 = vector.load %arg4[%c2_40, %c0_41, %c0_42] : memref<3x384x128xbf16, #tpu.memory_space<vmem>>, vector<1x384x128xbf16>
    %48 = vector.shape_cast %47 : vector<1x384x128xbf16> to vector<384x128xbf16>
    %cst_43 = arith.constant dense<0.000000e+00> : vector<64x128xf32>
    %49 = tpu.matmul %46, %48, %cst_43 {dimension_numbers = #tpu.dot_dimension_numbers<[1], [0], [0], [1], [0, 0, 1, 1], [], []>} : vector<64x384xbf16>, vector<384x128xbf16>, vector<64x128xf32> -> vector<64x128xf32>
    %50 = arith.addf %40, %49 : vector<64x128xf32>
    %c0_44 = arith.constant 0 : index
    %c0_45 = arith.constant 0 : index
    %c0_46 = arith.constant 0 : index
    %51 = vector.load %arg6[%c0_44, %c0_45, %c0_46] : memref<1x64x128xf32, #tpu.memory_space<vmem>>, vector<1x64x128xf32>
    %52 = vector.shape_cast %51 : vector<1x64x128xf32> to vector<64x128xf32>
    %53 = vector.shape_cast %50 : vector<64x128xf32> to vector<1x64x128xf32>
    tpu.vector_store %arg6[%c0_44, %c0_45, %c0_46], %53 {strides = array<i32>} : memref<1x64x128xf32, #tpu.memory_space<vmem>>, vector<1x64x128xf32>,
    %cst_47 = arith.constant dense<0.000000e+00> : vector<128xf32>
    %54 = vector.multi_reduction <add>, %50, %cst_47 [0] : vector<64x128xf32> to vector<128xf32>
    %55 = vector.shape_cast %54 : vector<128xf32> to vector<1x128xf32>
    %56 = arith.mulf %50, %50 : vector<64x128xf32>
    %cst_48 = arith.constant dense<0.000000e+00> : vector<128xf32>
    %57 = vector.multi_reduction <add>, %56, %cst_48 [0] : vector<64x128xf32> to vector<128xf32>
    %58 = vector.shape_cast %57 : vector<128xf32> to vector<1x128xf32>
    %59 = tpu.concatenate %55, %58 in 0 : vector<1x128xf32>, vector<1x128xf32> -> vector<2x128xf32>
    %c0_49 = arith.constant 0 : index
    %c0_50 = arith.constant 0 : index
    %c0_51 = arith.constant 0 : index
    %60 = vector.load %arg7[%c0_49, %c0_50, %c0_51] : memref<1x2x128xf32, #tpu.memory_space<vmem>>, vector<1x2x128xf32>
    %61 = vector.shape_cast %60 : vector<1x2x128xf32> to vector<2x128xf32>
    %62 = vector.shape_cast %59 : vector<2x128xf32> to vector<1x2x128xf32>
    tpu.vector_store %arg7[%c0_49, %c0_50, %c0_51], %62 {strides = array<i32>} : memref<1x2x128xf32, #tpu.memory_space<vmem>>, vector<1x2x128xf32>,
    return
  }
  func.func @transform_0(%arg0: i32) -> (i32, i32, i32) {
    %c0_i32 = arith.constant 0 : i32
    %c0_i32_0 = arith.constant 0 : i32
    %c0_i32_1 = arith.constant 0 : i32
    return %arg0, %c0_i32, %c0_i32_0 : i32, i32, i32
  }
  func.func @transform_1(%arg0: i32) -> (i32, i32) {
    %c0_i32 = arith.constant 0 : i32
    %c0_i32_0 = arith.constant 0 : i32
    %c0_i32_1 = arith.constant 0 : i32
    return %c0_i32, %c0_i32_0 : i32, i32
  }
  func.func @transform_2(%arg0: i32) -> (i32, i32) {
    %c0_i32 = arith.constant 0 : i32
    %c0_i32_0 = arith.constant 0 : i32
    %c0_i32_1 = arith.constant 0 : i32
    return %c0_i32, %c0_i32_0 : i32, i32
  }
  func.func @transform_3(%arg0: i32) -> (i32, i32, i32) {
    %c0_i32 = arith.constant 0 : i32
    %c0_i32_0 = arith.constant 0 : i32
    %c0_i32_1 = arith.constant 0 : i32
    %c0_i32_2 = arith.constant 0 : i32
    return %c0_i32, %c0_i32_0, %c0_i32_1 : i32, i32, i32
  }
  func.func @transform_4(%arg0: i32) -> (i32, i32, i32) {
    %c0_i32 = arith.constant 0 : i32
    %c0_i32_0 = arith.constant 0 : i32
    %c0_i32_1 = arith.constant 0 : i32
    return %arg0, %c0_i32, %c0_i32_0 : i32, i32, i32
  }
  func.func @transform_5(%arg0: i32) -> (i32, i32, i32) {
    %c0_i32 = arith.constant 0 : i32
    %c0_i32_0 = arith.constant 0 : i32
    %c0_i32_1 = arith.constant 0 : i32
    return %arg0, %c0_i32, %c0_i32_0 : i32, i32, i32
  }
  func.func @transform_6(%arg0: i32) -> (i32, i32, i32) {
    %c0_i32 = arith.constant 0 : i32
    %c0_i32_0 = arith.constant 0 : i32
    %c0_i32_1 = arith.constant 0 : i32
    return %arg0, %c0_i32, %c0_i32_0 : i32, i32, i32
  }
}

</mosaic_0001>

<bundles_post_ra>
// kernel: res_block_forward.5
= control target key start
LH: loop header
LB: loop body
LE: loop exit
PB: predicated region body
PF: predicated region fallthrough
CT: control target
= control target key end

     0   :  { %s430_s15 = smov 0   ;;  %s501_s0 = inlined_call_operand.vmem [shape: f32[2,64,128], index: 0, kind: input, shape index: {}]   ;;  %s502_s1 = inlined_call_operand.vmem [shape: f32[2,64,128], index: 1, kind: input, shape index: {}]   ;;  %s503_s2 = inlined_call_operand.vmem [shape: f32[1,128], index: 2, kind: input, shape index: {}]   ;;  %s504_s3 = inlined_call_operand.vmem [shape: f32[1,128], index: 3, kind: input, shape index: {}]   ;;  %s505_s4 = inlined_call_operand.vmem [shape: f32[2,64,128], index: 4, kind: output, shape index: {}]  }
   0x1 LB: > { %s371_s16 = sadd.s32 4294967295, %s403_s15   ;;  %p375_p0 = scmp.ge.s32.totalorder %s403_s15, 1  ;;  %s403_s15 = sphi %s430_s15, %s14_s15  }
   0x2   : > { %p172_p1 = scmp.lt.s32.totalorder %s403_s15, 3 }
   0x4   : > { %p173_p2 = pnand %p375_p0, %p172_p1 }
   0x5   : > { %p203_p3 = scmp.lt.s32.totalorder (!%p173_p2), %s371_s16, 1 }
   0x6   : > { %176 = sbr.rel (%p173_p2) target bundleno = 33 (0x21), region = 36 }
   0xb   : > { %s507_s16 = smov (!%p203_p3, %s371_s16), 1  ;;  %v382_v0 = vld [vmem:[%s503_s2] ss:$0 sm:$0xff] }
   0xc   : > { %s438_s17 = sshll.u32 %s507_s16, 6  ;;  %v458_v1 = vld [vmem:[%s504_s3] ss:$0 sm:$0xff] }
   0xd   : > { %s447_s22 = scalar_lea.vmem %s501_s0, %s438_s17  ;;  %s453_s25 = scalar_lea.vmem %s502_s1, %s438_s17 }
   0xe   : > { %v218_v2 = vld [vmem:[%s447_s22] sm:$0xff]  ;;  %v219_v4 = vld [vmem:[%s447_s22 + $0x8] sm:$0xff]  ;;  %v220_v8 = vld [vmem:[%s447_s22 + $0x10] sm:$0xff]  ;;  %s481_s30 = scalar_lea.vmem %s505_s4, %s438_s17 }
   0xf   : > { %v256_v3 = vld [vmem:[%s453_s25] sm:$0xff]  ;;  %v233_v5 = vmul.f32 %v382_v0, %v218_v2  ;;  %v234_v6 = vmul.f32 %v382_v0, %v219_v4  ;;  %v257_v7 = vld [vmem:[%s453_s25 + $0x8] sm:$0xff]  ;;  %v258_v9 = vld [vmem:[%s453_s25 + $0x10] sm:$0xff]  ;;  %v235_v12 = vmul.f32 %v382_v0, %v220_v8 }
  0x10   : > { %v264_v10 = vsub.f32 0.0, %v256_v3  ;;  %v265_v11 = vsub.f32 0.0, %v257_v7  ;;  %v221_v13 = vld [vmem:[%s447_s22 + $0x18] sm:$0xff]  ;;  %v222_v15 = vld [vmem:[%s447_s22 + $0x20] sm:$0xff]  ;;  %v266_v18 = vsub.f32 0.0, %v258_v9  ;;  %v223_v21 = vld [vmem:[%s447_s22 + $0x28] sm:$0xff] }
  0x11   : > { %v259_v14 = vld [vmem:[%s453_s25 + $0x18] sm:$0xff]  ;;  %v248_v16 = vadd.f32 %v458_v1, %v233_v5  ;;  %v249_v17 = vadd.f32 %v458_v1, %v234_v6  ;;  %v236_v19 = vmul.f32 %v382_v0, %v221_v13  ;;  %v260_v20 = vld [vmem:[%s453_s25 + $0x20] sm:$0xff]  ;;  %v250_v22 = vadd.f32 %v458_v1, %v235_v12  ;;  %v261_v26 = vld [vmem:[%s453_s25 + $0x28] sm:$0xff] }
  0x12   : > { %v267_v23 = vsub.f32 0.0, %v259_v14  ;;  %v237_v24 = vmul.f32 %v382_v0, %v222_v15  ;;  %v238_v25 = vmul.f32 %v382_v0, %v223_v21  ;;  %v224_v27 = vld [vmem:[%s447_s22 + $0x30] sm:$0xff]  ;;  %v268_v31 = vsub.f32 0.0, %v260_v20  ;;  %v225_v39 = vld [vmem:[%s447_s22 + $0x38] sm:$0xff] }
  0x13   : > { %v272_v28 = vadd.f32 %v256_v3, %v248_v16  ;;  %v273_v29 = vadd.f32 %v257_v7, %v249_v17  ;;  %v251_v30 = vadd.f32 %v458_v1, %v236_v19  ;;  %v274_v32 = vadd.f32 %v258_v9, %v250_v22  ;;  %v262_v38 = vld [vmem:[%s453_s25 + $0x30] sm:$0xff]  ;;  %v263_v49 = vld [vmem:[%s453_s25 + $0x38] sm:$0xff] }
  0x14   : > { %v252_v33 = vadd.f32 %v458_v1, %v237_v24  ;;  %v253_v34 = vadd.f32 %v458_v1, %v238_v25  ;;  %v239_v35 = vmul.f32 %v382_v0, %v224_v27  ;;  %v269_v37 = vsub.f32 0.0, %v261_v26 }
  0x15   : > { %vm280_vm0 = vcmp.gt.f32.partialorder %v272_v28, 0.0  ;;  %vm281_vm1 = vcmp.gt.f32.partialorder %v273_v29, 0.0  ;;  %v275_v36 = vadd.f32 %v259_v14, %v251_v30  ;;  %vm282_vm2 = vcmp.gt.f32.partialorder %v274_v32, 0.0 }
  0x16   : > { %v288_v40 = vsel %vm280_vm0, %v248_v16, %v264_v10  ;;  %v289_v41 = vsel %vm281_vm1, %v249_v17, %v265_v11  ;;  %v276_v42 = vadd.f32 %v260_v20, %v252_v33  ;;  %v290_v43 = vsel %vm282_vm2, %v250_v22, %v266_v18 }
  0x17   : > { %296 = vst [vmem:[%s481_s30] sm:$0xff] %v288_v40  ;;  %297 = vst [vmem:[%s481_s30 + $0x8] sm:$0xff] %v289_v41  ;;  %vm283_vm3 = vcmp.gt.f32.partialorder %v275_v36, 0.0  ;;  %v277_v44 = vadd.f32 %v261_v26, %v253_v34  ;;  %v254_v45 = vadd.f32 %v458_v1, %v239_v35  ;;  %v270_v47 = vsub.f32 0.0, %v262_v38 }
  0x18   : > { %298 = vst [vmem:[%s481_s30 + $0x10] sm:$0xff] %v290_v43  ;;  %v291_v46 = vsel %vm283_vm3, %v251_v30, %v267_v23  ;;  %vm284_vm4 = vcmp.gt.f32.partialorder %v276_v42, 0.0  ;;  %v240_v48 = vmul.f32 %v382_v0, %v225_v39  ;;  %v271_v54 = vsub.f32 0.0, %v263_v49 }
  0x19   : > { %299 = vst [vmem:[%s481_s30 + $0x18] sm:$0xff] %v291_v46  ;;  %v292_v50 = vsel %vm284_vm4, %v252_v33, %v268_v31  ;;  %vm285_vm5 = vcmp.gt.f32.partialorder %v277_v44, 0.0  ;;  %v278_v51 = vadd.f32 %v262_v38, %v254_v45 }
  0x1a   : > { %300 = vst [vmem:[%s481_s30 + $0x20] sm:$0xff] %v292_v50  ;;  %v293_v52 = vsel %vm285_vm5, %v253_v34, %v269_v37  ;;  %v255_v53 = vadd.f32 %v458_v1, %v240_v48 }
  0x1b   : > { %301 = vst [vmem:[%s481_s30 + $0x28] sm:$0xff] %v293_v52  ;;  %vm286_vm6 = vcmp.gt.f32.partialorder %v278_v51, 0.0 }
  0x1c   : > { %v294_v55 = vsel %vm286_vm6, %v254_v45, %v270_v47  ;;  %v279_v56 = vadd.f32 %v263_v49, %v255_v53 }
  0x1d   : > { %302 = vst [vmem:[%s481_s30 + $0x30] sm:$0xff] %v294_v55 }
  0x1e   : > { %vm287_vm7 = vcmp.gt.f32.partialorder %v279_v56, 0.0 }
  0x1f   : > { %v295_v57 = vsel %vm287_vm7, %v255_v53, %v271_v54 }
  0x20   : > { %303 = vst [vmem:[%s481_s30 + $0x38] sm:$0xff] %v295_v57 }
  0x21 PF: > { %s14_s15 = sadd.s32 1, %s403_s15  }
  0x22   : > { %p11_p4 = scmp.ge.s32.totalorder %s14_s15, 4  }
  0x24   :  { %13 = sbr.rel (!%p11_p4) target bundleno = 1 (0x1), region = 69 }

// kernel: res_block_forward.3
= control target key start
LH: loop header
LB: loop body
LE: loop exit
PB: predicated region body
PF: predicated region fallthrough
CT: control target
= control target key end

     0   :  { %s2417_s12 = smov 0   ;;  %s2846_s0 = inlined_call_operand.vmem [shape: bf16[2,10,10,128], index: 0, kind: input, shape index: {}]   ;;  %s2847_s1 = inlined_call_operand.vmem [shape: bf16[3,384,128], index: 1, kind: input, shape index: {}]   ;;  %s2848_s2 = inlined_call_operand.vmem [shape: f32[2,64,128], index: 2, kind: output, shape index: {0}]   ;;  %s2849_s3 = inlined_call_operand.vmem [shape: f32[2,2,128], index: 3, kind: output, shape index: {1}]  }
   0x1 LB: > { %s1772_s13 = sadd.s32 4294967295, %s2395_s12   ;;  %p1776_p0 = scmp.ge.s32.totalorder %s2395_s12, 1  ;;  %s2395_s12 = sphi %s2417_s12, %s14_s12  }
   0x2   : > { %p140_p1 = scmp.lt.s32.totalorder %s2395_s12, 3 }
   0x4   : > { %p141_p2 = pnand %p1776_p0, %p140_p1 }
   0x5   : > { %p168_p3 = scmp.lt.s32.totalorder (!%p141_p2), %s1772_s13, 1 }
   0x6   : > { %144 = sbr.rel (%p141_p2) target bundleno = 355 (0x163), region = 28 }
   0xb   : > { %v2281_v0 = vld [vmem:[%s2847_s1 + $0x138] sm:$0xff]   ;;  %v2284_v3 = vld [vmem:[%s2847_s1 + $0x130] sm:$0xff]   ;;  %v2287_v6 = vld [vmem:[%s2847_s1 + $0x128] sm:$0xff]   ;;  %s2851_s13 = smov (!%p168_p3, %s1772_s13), 1  ;;  %vm1683_vm0 = vcmask 1040384  }
   0xc   : > { %v2282_v1 = vld [vmem:[%s2847_s1 + $0xf8] sm:$0xff]   ;;  %2044 = vmatprep.subr.bf16.mxu0 %v2281_v0  ;;  %v2285_v4 = vld [vmem:[%s2847_s1 + $0xf0] sm:$0xff]   ;;  %v2288_v7 = vld [vmem:[%s2847_s1 + $0xe8] sm:$0xff]   ;;  %s2272_s21 = smul.u32 80, %s2851_s13  ;;  %s1780_s19 = sshll.u32 %s2851_s13, 1 }
   0xd   : > { %v2283_v2 = vld [vmem:[%s2847_s1 + $0x178] sm:$0xff]   ;;  %2045 = vmatpush3.bf16.msra.mxu0 %v2282_v1  ;;  %v2286_v5 = vld [vmem:[%s2847_s1 + $0x170] sm:$0xff]   ;;  %v2289_v8 = vld [vmem:[%s2847_s1 + $0x168] sm:$0xff]   ;;  %s181_s22 = scalar_lea.vmem %s2849_s3, %s1780_s19 }
   0xe   : > { %2200 = vmatprep.subr.bf16.mxu1 %v2283_v2  ;;  %2046 = vmatprep.subr.bf16.mxu0 %v2284_v3  ;;  %v2290_v9 = vld [vmem:[%s2847_s1 + $0x120] sm:$0xff]   ;;  %v2293_v12 = vld [vmem:[%s2847_s1 + $0x118] sm:$0xff]   ;;  %v2296_v15 = vld [vmem:[%s2847_s1 + $0x110] sm:$0xff]   ;;  %s2495_s5 = scalar_lea.vmem %s2846_s0, %s2272_s21 }
   0xf   : > { %2201 = vmatpush3.bf16.msra.mxu1 %v2283_v2  ;;  %v2291_v10 = vld [vmem:[%s2847_s1 + $0xe0] sm:$0xff]   ;;  %v2295_v13 = vld [vmem:[%s2847_s1 + $0x158] sm:$0xff]   ;;  %v2298_v16 = vld [vmem:[%s2847_s1 + $0x150] sm:$0xff]  }
  0x10   : > { %2202 = vmatprep.subr.bf16.mxu1 %v2286_v5  ;;  %v2292_v11 = vld [vmem:[%s2847_s1 + $0x160] sm:$0xff]   ;;  %v2294_v14 = vld [vmem:[%s2847_s1 + $0xd8] sm:$0xff]   ;;  %v2297_v17 = vld [vmem:[%s2847_s1 + $0xd0] sm:$0xff]  }
  0x11   : > { %2047 = vmatpush3.bf16.msra.mxu0 %v2285_v4  ;;  %v2299_v18 = vld [vmem:[%s2847_s1 + $0x108] sm:$0xff]   ;;  %v2302_v21 = vld [vmem:[%s2847_s1 + $0x100] sm:$0xff]   ;;  %v1791_v24 = vld [vmem:[%s2495_s5 + $0x10] sm:$0xf] }
  0x12   : > { %2048 = vmatprep.subr.bf16.mxu0 %v2287_v6  ;;  %v2300_v19 = vld [vmem:[%s2847_s1 + $0xc8] sm:$0xff]   ;;  %v1792_v25 = vld [vmem:[%s2495_s5 + $0x14] sm:$0x1]  ;;  %v2304_v27 = vld [vmem:[%s2847_s1 + $0x140] sm:$0xff]  }
  0x13   : > { %2203 = vmatpush3.bf16.msra.mxu1 %v2286_v5  ;;  %v2301_v20 = vld [vmem:[%s2847_s1 + $0x148] sm:$0xff]   ;;  %v1806_v28 = vcombine.low %v1791_v24, %v1792_v25  ;;  %v2303_v29 = vld [vmem:[%s2847_s1 + $0xc0] sm:$0xff]   ;;  %v2514_v33 = vld [vmem:[%s2495_s5 + $0x18] sm:$0xf] }
  0x14   : > { %2204 = vmatprep.subr.bf16.mxu1 %v2289_v8  ;;  %v1789_v22 = vld [vmem:[%s2495_s5 + $0x8] sm:$0xf]  ;;  %v1790_v23 = vld [vmem:[%s2495_s5 + $0xc] sm:$0x1]  ;;  %v2308_v36 = vld [vmem:[%s2847_s1 + $0x78] sm:$0xff]  }
  0x15   : > { %2049 = vmatpush3.bf16.msra.mxu0 %v2288_v7  ;;  %v1805_v26 = vcombine.low %v1789_v22, %v1790_v23  ;;  %v432_v34 = vshrl.u32 %v1806_v28, 16  ;;  %v434_v35 = vshll.u32 %v1806_v28, 16  ;;  %v481_v37 = vrot.slane %v1806_v28, 1  ;;  %v1794_v38 = vld [vmem:[%s2495_s5 + $0x1c] sm:$0x1]  ;;  %v2315_v52 = vld [vmem:[%s2847_s1 + $0xb0] sm:$0xff]  }
  0x16   : > { %2050 = vmatprep.subr.bf16.mxu0 %v2290_v9  ;;  %v2521_v40 = vld [vmem:[%s2495_s5 + $0x20] sm:$0xf]  ;;  %v1796_v41 = vld [vmem:[%s2495_s5 + $0x24] sm:$0x1]  ;;  %v1807_v42 = vcombine.low %v2514_v33, %v1794_v38  ;;  %v2312_v46 = vld [vmem:[%s2847_s1 + $0xb8] sm:$0xff]   ;;  %v1861_v53 = vcombine.low %v1789_v22, %v1791_v24 }
  0x17   : > { %2205 = vmatpush3.bf16.msra.mxu1 %v2289_v8  ;;  %v425_v30 = vshrl.u32 %v1805_v26, 16  ;;  %v427_v31 = vshll.u32 %v1805_v26, 16  ;;  %v480_v32 = vrot.slane %v1805_v26, 1  ;;  %v436_v43 = vrot.slane %v434_v35, 1  ;;  %v2309_v50 = vld [vmem:[%s2847_s1 + $0x38] sm:$0xff]   ;;  %v2313_v60 = vld [vmem:[%s2847_s1 + $0x70] sm:$0xff]  }
  0x18   : > { %2206 = vmatprep.subr.bf16.mxu1 %v2292_v11  ;;  %v1808_v45 = vcombine.low %v2521_v40, %v1796_v41  ;;  %v482_v48 = vrot.slane %v1807_v42, 1  ;;  %v439_v54 = vshrl.u32 %v1807_v42, 16  ;;  %v441_v55 = vshll.u32 %v1807_v42, 16  ;;  %v2314_v63 = vld [vmem:[%s2847_s1 + $0x30] sm:$0xff]   ;;  %v2317_v2 = vld [vmem:[%s2847_s1 + $0x68] sm:$0xff]   ;;  %v2321_v23 = vld [vmem:[%s2847_s1 + $0x20] sm:$0xff]  }
  0x19   : > { %2051 = vmatpush3.bf16.msra.mxu0 %v2291_v10  ;;  %v429_v39 = vrot.slane %v427_v31, 1  ;;  %v1863_v44 = vcombine.low %v480_v32, %v481_v37  ;;  %v437_v49 = vor.u32 %v436_v43, %v432_v34  ;;  %v2319_v3 = vld [vmem:[%s2847_s1 + $0xa8] sm:$0xff]   ;;  %v1799_v8 = vld [vmem:[%s2495_s5 + $0x30] sm:$0xf]  ;;  %v1864_v9 = vcombine.low %v2514_v33, %v2521_v40  ;;  %v1800_v10 = vld [vmem:[%s2495_s5 + $0x34] sm:$0x1] }
  0x1a   : > { %2052 = vmatprep.subr.bf16.mxu0 %v2293_v12  ;;  %v483_v51 = vrot.slane %v1808_v45, 1  ;;  %v446_v58 = vshrl.u32 %v1808_v45, 16  ;;  %v448_v59 = vshll.u32 %v1808_v45, 16  ;;  %v443_v61 = vrot.slane %v441_v55, 1  ;;  %v2318_v5 = vld [vmem:[%s2847_s1 + $0x28] sm:$0xff]   ;;  %v2322_v12 = vld [vmem:[%s2847_s1 + $0xa0] sm:$0xff]  }
  0x1b   : > { %2207 = vmatpush3.bf16.msra.mxu1 %v2292_v11  ;;  %v430_v47 = vor.u32 %v429_v39, %v425_v30  ;;  %2216 = vmatprep.mubr.bf16.mxu1 %v1863_v44  ;;  %v1797_v6 = vld [vmem:[%s2495_s5 + $0x28] sm:$0xf]  ;;  %v1798_v7 = vld [vmem:[%s2495_s5 + $0x2c] sm:$0x1]  ;;  %v1802_v22 = vld [vmem:[%s2495_s5 + $0x3c] sm:$0x1] }
  0x1c   : > { %2208 = vmatprep.subr.bf16.mxu1 %v2295_v13  ;;  %v1866_v57 = vcombine.low %v482_v48, %v483_v51  ;;  %v450_v62 = vrot.slane %v448_v59, 1  ;;  %v444_v0 = vor.u32 %v443_v61, %v439_v54  ;;  %v1809_v11 = vcombine.low %v1797_v6, %v1798_v7  ;;  %v2570_v25 = vld [vmem:[%s2495_s5 + $0x40] sm:$0xf]  ;;  %v1804_v26 = vld [vmem:[%s2495_s5 + $0x44] sm:$0x1]  ;;  %v2330_v31 = vld [vmem:[%s2847_s1 + $0x98] sm:$0xff]  }
  0x1d   : > { %2053 = vmatpush3.bf16.msra.mxu0 %v2294_v14  ;;  %v1862_v56 = vcombine.low %v430_v47, %v437_v49  ;;  %v2320_v14 = vld [vmem:[%s2847_s1 + $0x60] sm:$0xff]   ;;  %v1812_v30 = vcombine.low %v2570_v25, %v1804_v26  ;;  %v2326_v33 = vld [vmem:[%s2847_s1 + $0x58] sm:$0xff]   ;;  %v2333_v38 = vld [vmem:[%s2847_s1 + $0x90] sm:$0xff]   ;;  %v1867_v39 = vcombine.low %v1797_v6, %v1799_v8 }
  0x1e   : > { %2054 = vmatprep.subr.bf16.mxu0 %v2296_v15  ;;  %v451_v1 = vor.u32 %v450_v62, %v446_v58  ;;  %v453_v15 = vshrl.u32 %v1809_v11, 16  ;;  %v2332_v49 = vld [vmem:[%s2847_s1 + $0x10] sm:$0xff]   ;;  %v2336_v55 = vld [vmem:[%s2847_s1 + $0x8] sm:$0xff]   ;;  %v2340_v62 = vld [vmem:[%s2847_s1 + $0x80] sm:$0xff]  }
  0x1f   : > { %2209 = vmatpush3.bf16.msra.mxu1 %v2295_v13  ;;  %753 = vmatprep.mubr.bf16.mxu0 %v1862_v56  ;;  %v1810_v13 = vcombine.low %v1799_v8, %v1800_v10  ;;  %v487_v37 = vrot.slane %v1812_v30, 1  ;;  %v474_v44 = vshrl.u32 %v1812_v30, 16  ;;  %v476_v45 = vshll.u32 %v1812_v30, 16  ;;  %v183_v56 = vld [vmem:[%s2495_s5] sm:$0xf] }
  0x20   : > { %2210 = vmatprep.subr.bf16.mxu1 %v2298_v16  ;;  %v1865_v4 = vcombine.low %v444_v0, %v451_v1  ;;  %v185_v58 = vld [vmem:[%s2495_s5 + $0x8] sm:$0xf]  ;;  %v2338_v0 = vld [vmem:[%s2847_s1 + $0x40] sm:$0xff]   ;;  %v2621_v10 = vld [vmem:[%s2495_s5 + $0x10] sm:$0xf] }
  0x21   : > { %2055 = vmatpush3.bf16.msra.mxu0 %v2297_v17  ;;  %v484_v17 = vrot.slane %v1809_v11, 1  ;;  %v478_v48 = vrot.slane %v476_v45, 1  ;;  %v194_v45 = vld [vmem:[%s2495_s5 + $0x2c] sm:$0x1] }
  0x22   : > { %2056 = vmatprep.subr.bf16.mxu0 %v2299_v18  ;;  %v2563_v18 = vld [vmem:[%s2495_s5 + $0x38] sm:$0xf] }
  0x23   : > { %2211 = vmatpush3.bf16.msra.mxu1 %v2298_v16  ;;  %v455_v16 = vshll.u32 %v1809_v11, 16  ;;  %v479_v51 = vor.u32 %v478_v48, %v474_v44  ;;  %v1870_v59 = vcombine.low %v2563_v18, %v2570_v25  ;;  %v188_v11 = vld [vmem:[%s2495_s5 + $0x14] sm:$0x1] }
  0x24   : > { %2212 = vmatprep.subr.bf16.mxu1 %v2301_v20  ;;  %v2349_v25 = vld [vmem:[%s2847_s1 + $0x1f0] sm:$0xff]  }
  0x25   : > { %2057 = vmatpush3.bf16.msra.mxu0 %v2300_v19  ;;  %v460_v19 = vshrl.u32 %v1810_v13, 16  ;;  %v457_v24 = vrot.slane %v455_v16, 1  ;;  %v190_v16 = vld [vmem:[%s2495_s5 + $0x1c] sm:$0x1] }
  0x26   : > { %2058 = vmatprep.subr.bf16.mxu0 %v2302_v21  ;;  %v485_v21 = vrot.slane %v1810_v13, 1 }
  0x27   : > { %2213 = vmatpush3.bf16.msra.mxu1 %v2301_v20  ;;  %v462_v20 = vshll.u32 %v1810_v13, 16  ;;  %v458_v32 = vor.u32 %v457_v24, %v453_v15  ;;  %v189_v15 = vld [vmem:[%s2495_s5 + $0x18] sm:$0xf] }
  0x28   : > { %2214 = vmatprep.subr.bf16.mxu1 %v2304_v27  ;;  %v1900_v44 = vcombine.low %v2621_v10, %v189_v15 }
  0x29   : > { %2059 = vmatpush3.bf16.msra.mxu0 %v2303_v29  ;;  %v464_v28 = vrot.slane %v462_v20, 1  ;;  %v1869_v29 = vcombine.low %v484_v17, %v485_v21  ;;  %v1783_v17 = vcombine.low %v2621_v10, %v188_v11  ;;  %v2345_v21 = vld [vmem:[%s2847_s1 + $0x1b8] sm:$0xff]  }
  0x2a   : > { %2096 = vmatprep.subr.bf16.mxu0 %v2308_v36  ;;  %v2327_v36 = vld [vmem:[%s2847_s1 + $0x18] sm:$0xff]  }
  0x2b   : > { %2215 = vmatpush3.bf16.msra.mxu1 %v2304_v27  ;;  %v1811_v27 = vcombine.low %v2563_v18, %v1802_v22  ;;  %v465_v35 = vor.u32 %v464_v28, %v460_v19  ;;  %v1784_v19 = vcombine.low %v189_v15, %v190_v16  ;;  %v297_v22 = vrot.slane %v1783_v17, 1 }
  0x2c   : > { %2224 = vmatprep.subr.bf16.mxu1 %v2312_v46  ;;  %754 = vmatmul.mubr.bf16.vlgmr.msra.gmra.mxu0 %v1861_v53  ;;  %v2337_v53 = vld [vmem:[%s2847_s1 + $0x88] sm:$0xff]   ;;  %v254_v26 = vshrl.u32 %v1783_v17, 16 }
  0x2d   : > { %2097 = vmatpush3.bf16.msra.mxu0 %v2309_v50  ;;  %761 = vmatprep.mubr.bf16.mxu0 %v1865_v4  ;;  %v486_v34 = vrot.slane %v1811_v27, 1  ;;  %v467_v40 = vshrl.u32 %v1811_v27, 16  ;;  %v469_v41 = vshll.u32 %v1811_v27, 16  ;;  %v1868_v42 = vcombine.low %v458_v32, %v465_v35  ;;  %v2339_v4 = vld [vmem:[%s2847_s1] sm:$0xff]   ;;  %v2351_v32 = vld [vmem:[%s2847_s1 + $0x230] sm:$0xff]  }
  0x2e   : > { %2217 = vmatmul.mubr.bf16.vlgmr.msra.gmra.mxu1 %v1866_v57  ;;  %2098 = vmatprep.subr.bf16.mxu0 %v2313_v60  ;;  %v184_v57 = vld [vmem:[%s2495_s5 + $0x4] sm:$0x1]  ;;  %v186_v60 = vld [vmem:[%s2495_s5 + $0xc] sm:$0x1]  ;;  %v298_v24 = vrot.slane %v1784_v19, 1  ;;  %v256_v27 = vshll.u32 %v1783_v17, 16 }
  0x2f   : > { %2225 = vmatpush3.bf16.msra.mxu1 %v2312_v46  ;;  %2220 = vmatprep.mubr.bf16.mxu1 %v1869_v29  ;;  %v1872_v43 = vcombine.low %v486_v34, %v487_v37  ;;  %v2331_v46 = vld [vmem:[%s2847_s1 + $0x50] sm:$0xff]   ;;  %v471_v47 = vrot.slane %v469_v41, 1  ;;  %v1781_v61 = vcombine.low %v183_v56, %v184_v57  ;;  %v261_v29 = vshrl.u32 %v1784_v19, 16  ;;  %v191_v41 = vld [vmem:[%s2495_s5 + $0x20] sm:$0xf] }
  0x30   : > { %2226 = vmatprep.subr.bf16.mxu1 %v2315_v52  ;;  %v263_v30 = vshll.u32 %v1784_v19, 16  ;;  %v2350_v35 = vld [vmem:[%s2847_s1 + $0x1b0] sm:$0xff]   ;;  %v2357_v57 = vld [vmem:[%s2847_s1 + $0x1a0] sm:$0xff]  }
  0x31   : > { %2099 = vmatpush3.bf16.msra.mxu0 %v2314_v63  ;;  %v472_v50 = vor.u32 %v471_v47, %v467_v40  ;;  %v1782_v63 = vcombine.low %v185_v58, %v186_v60  ;;  %v240_v1 = vshrl.u32 %v1781_v61, 16  ;;  %v2354_v47 = vld [vmem:[%s2847_s1 + $0x1a8] sm:$0xff]   ;;  %v196_v60 = vld [vmem:[%s2495_s5 + $0x34] sm:$0x1] }
  0x32   : > { %2100 = vmatprep.subr.bf16.mxu0 %v2317_v2  ;;  %v242_v2 = vshll.u32 %v1781_v61, 16  ;;  %v265_v34 = vrot.slane %v263_v30, 1  ;;  %v2367_v17 = vld [vmem:[%s2847_s1 + $0x1d0] sm:$0xff]   ;;  %v2707_v30 = vld [vmem:[%s2495_s5 + $0x18] sm:$0xf] }
  0x33   : > { %2227 = vmatpush3.bf16.msra.mxu1 %v2315_v52  ;;  %v2335_v52 = vld [vmem:[%s2847_s1 + $0x48] sm:$0xff]   ;;  %v1871_v54 = vcombine.low %v472_v50, %v479_v51  ;;  %v249_v6 = vshll.u32 %v1782_v63, 16  ;;  %v296_v7 = vrot.slane %v1782_v63, 1  ;;  %v2358_v50 = vld [vmem:[%s2847_s1 + $0x220] sm:$0xff]   ;;  %v2369_v19 = vld [vmem:[%s2847_s1 + $0x210] sm:$0xff]  }
  0x34   : > { %2228 = vmatprep.subr.bf16.mxu1 %v2319_v3  ;;  %762 = vmatmul.mubr.bf16.gmra.mxu0 %v1864_v9  ;;  %v244_v8 = vrot.slane %v242_v2, 1  ;;  %v2344_v9 = vld [vmem:[%s2847_s1 + $0x1f8] sm:$0xff]   ;;  %v266_v37 = vor.u32 %v265_v34, %v261_v29  ;;  %v1934_v29 = vld [vmem:[%s2495_s5 + $0x14] sm:$0x1]  ;;  %v2714_v34 = vld [vmem:[%s2495_s5 + $0x20] sm:$0xf] }
  0x35   : > { %2101 = vmatpush3.bf16.msra.mxu0 %v2318_v5  ;;  %769 = vmatprep.mubr.bf16.mxu0 %v1868_v42  ;;  %v247_v5 = vshrl.u32 %v1782_v63, 16  ;;  %v192_v42 = vld [vmem:[%s2495_s5 + $0x24] sm:$0x1] }
  0x36   : > { %2102 = vmatprep.subr.bf16.mxu0 %v2320_v14  ;;  %2221 = vmatmul.mubr.bf16.gmra.mxu1 %v1872_v43  ;;  %v2346_v14 = vld [vmem:[%s2847_s1 + $0x238] sm:$0xff]   ;;  %v245_v18 = vor.u32 %v244_v8, %v240_v1  ;;  %v193_v43 = vld [vmem:[%s2495_s5 + $0x28] sm:$0xf] }
  0x37   : > { %2229 = vmatpush3.bf16.msra.mxu1 %v2319_v3  ;;  %v295_v3 = vrot.slane %v1781_v61, 1  ;;  %v1786_v48 = vcombine.low %v193_v43, %v194_v45  ;;  %v198_v1 = vld [vmem:[%s2495_s5 + $0x3c] sm:$0x1]  ;;  %v1903_v8 = vcombine.low %v191_v41, %v193_v43 }
  0x38   : > { %2230 = vmatprep.subr.bf16.mxu1 %v2322_v12 }
  0x39   : > { %2103 = vmatpush3.bf16.msra.mxu0 %v2321_v23  ;;  %v1899_v13 = vcombine.low %v295_v3, %v296_v7  ;;  %v1897_v23 = vcombine.low %v183_v56, %v185_v58  ;;  %v300_v56 = vrot.slane %v1786_v48, 1 }
  0x3a   : > { %2104 = vmatprep.subr.bf16.mxu0 %v2326_v33  ;;  %v258_v33 = vrot.slane %v256_v27, 1  ;;  %v2372_v27 = vld [vmem:[%s2847_s1 + $0x188] sm:$0xff]  }
  0x3b   : > { %2231 = vmatpush3.bf16.msra.mxu1 %v2322_v12  ;;  %v251_v12 = vrot.slane %v249_v6, 1  ;;  %2240 = vmatprep.mubr.bf16.mxu1 %v1899_v13  ;;  %v2364_v6 = vld [vmem:[%s2847_s1 + $0x218] sm:$0xff]  }
  0x3c   : > { %2232 = vmatprep.subr.bf16.mxu1 %v2330_v31  ;;  %770 = vmatmul.mubr.bf16.gmra.mxu0 %v1867_v39  ;;  %v2355_v39 = vld [vmem:[%s2847_s1 + $0x228] sm:$0xff]  }
  0x3d   : > { %2105 = vmatpush3.bf16.msra.mxu0 %v2327_v36  ;;  %777 = vmatprep.mubr.bf16.mxu0 %v1871_v54  ;;  %v252_v20 = vor.u32 %v251_v12, %v247_v5  ;;  %v259_v36 = vor.u32 %v258_v33, %v254_v26  ;;  %v277_v54 = vshll.u32 %v1786_v48, 16 }
  0x3e   : > { %2106 = vmatprep.subr.bf16.mxu0 %v2331_v46  ;;  %v1785_v46 = vcombine.low %v191_v41, %v192_v42  ;;  %v2376_v41 = vld [vmem:[%s2847_s1 + $0x200] sm:$0xff]  }
  0x3f   : > { %2233 = vmatpush3.bf16.msra.mxu1 %v2330_v31  ;;  %v1898_v28 = vcombine.low %v245_v18, %v252_v20  ;;  %v1902_v31 = vcombine.low %v297_v22, %v298_v24  ;;  %v1901_v40 = vcombine.low %v259_v36, %v266_v37  ;;  %v279_v61 = vrot.slane %v277_v54, 1  ;;  %v2371_v24 = vld [vmem:[%s2847_s1 + $0x1c8] sm:$0xff]   ;;  %v2374_v36 = vld [vmem:[%s2847_s1 + $0x1c0] sm:$0xff]  }
  0x40   : > { %2234 = vmatprep.subr.bf16.mxu1 %v2333_v38  ;;  %v268_v51 = vshrl.u32 %v1785_v46, 16 }
  0x41   : > { %2107 = vmatpush3.bf16.msra.mxu0 %v2332_v49  ;;  %v2356_v49 = vld [vmem:[%s2847_s1 + $0x1e0] sm:$0xff]  }
  0x42   : > { %2108 = vmatprep.subr.bf16.mxu0 %v2335_v52  ;;  %v270_v52 = vshll.u32 %v1785_v46, 16 }
  0x43   : > { %2235 = vmatpush3.bf16.msra.mxu1 %v2333_v38  ;;  %v2353_v38 = vld [vmem:[%s2847_s1 + $0x1e8] sm:$0xff]  }
  0x44   : > { %2236 = vmatprep.subr.bf16.mxu1 %v2337_v53  ;;  %778 = vmatmul.mubr.bf16.gmra.mxu0 %v1870_v59  ;;  %v272_v58 = vrot.slane %v270_v52, 1  ;;  %v2666_v59 = vld [vmem:[%s2495_s5 + $0x30] sm:$0xf]  ;;  %v2735_v52 = vld [vmem:[%s2495_s5 + $0x38] sm:$0xf] }
  0x45   : > { %2109 = vmatpush3.bf16.msra.mxu0 %v2336_v55  ;;  %1051 = vmatprep.mubr.bf16.mxu0 %v1898_v28  ;;  %v299_v55 = vrot.slane %v1785_v46, 1  ;;  %v1787_v2 = vcombine.low %v2666_v59, %v196_v60  ;;  %v2703_v28 = vld [vmem:[%s2495_s5 + $0x10] sm:$0xf] }
  0x46   : > { %2110 = vmatprep.subr.bf16.mxu0 %v2338_v0  ;;  %v2673_v0 = vld [vmem:[%s2495_s5 + $0x38] sm:$0xf]  ;;  %v273_v3 = vor.u32 %v272_v58, %v268_v51  ;;  %v1949_v33 = vcombine.low %v2703_v28, %v1934_v29  ;;  %v2731_v46 = vld [vmem:[%s2495_s5 + $0x30] sm:$0xf]  ;;  %v2375_v58 = vld [vmem:[%s2847_s1 + $0x180] sm:$0xff]  }
  0x47   : > { %2237 = vmatpush3.bf16.msra.mxu1 %v2337_v53  ;;  %v275_v53 = vshrl.u32 %v1786_v48, 16  ;;  %v1905_v63 = vcombine.low %v299_v55, %v300_v56  ;;  %v301_v7 = vrot.slane %v1787_v2, 1  ;;  %v282_v11 = vshrl.u32 %v1787_v2, 16 }
  0x48   : > { %2238 = vmatprep.subr.bf16.mxu1 %v2340_v62  ;;  %v284_v12 = vshll.u32 %v1787_v2, 16  ;;  %v1207_v42 = vshrl.u32 %v1949_v33, 16  ;;  %v1209_v43 = vshll.u32 %v1949_v33, 16 }
  0x49   : > { %2111 = vmatpush3.bf16.msra.mxu0 %v2339_v4  ;;  %v1788_v4 = vcombine.low %v2673_v0, %v198_v1  ;;  %v280_v5 = vor.u32 %v279_v61, %v275_v53  ;;  %v2005_v1 = vcombine.low %v2703_v28, %v2707_v30 }
  0x4a   : > { %2148 = vmatprep.subr.bf16.mxu0 %v2344_v9  ;;  %v2363_v9 = vld [vmem:[%s2847_s1 + $0x198] sm:$0xff]   ;;  %v286_v18 = vrot.slane %v284_v12, 1  ;;  %v1211_v53 = vrot.slane %v1209_v43, 1  ;;  %v2011_v43 = vcombine.low %v2731_v46, %v2735_v52 }
  0x4b   : > { %2239 = vmatpush3.bf16.msra.mxu1 %v2340_v62  ;;  %v2362_v62 = vld [vmem:[%s2847_s1 + $0x1d8] sm:$0xff]   ;;  %v302_v10 = vrot.slane %v1788_v4, 1  ;;  %v1904_v13 = vcombine.low %v273_v3, %v280_v5  ;;  %v291_v15 = vshll.u32 %v1788_v4, 16  ;;  %v1946_v3 = vld [vmem:[%s2495_s5 + $0x44] sm:$0x1] }
  0x4c   : > { %2248 = vmatprep.subr.bf16.mxu1 %v2346_v14  ;;  %1052 = vmatmul.mubr.bf16.vlgmr.msra.gmra.mxu0 %v1897_v23  ;;  %v287_v22 = vor.u32 %v286_v18, %v282_v11 }
  0x4d   : > { %2149 = vmatpush3.bf16.msra.mxu0 %v2345_v21  ;;  %1059 = vmatprep.mubr.bf16.mxu0 %v1901_v40  ;;  %v1908_v16 = vcombine.low %v301_v7, %v302_v10  ;;  %v293_v20 = vrot.slane %v291_v15, 1  ;;  %v2368_v21 = vld [vmem:[%s2847_s1 + $0x190] sm:$0xff]  }
  0x4e   : > { %2241 = vmatmul.mubr.bf16.vlgmr.msra.gmra.mxu1 %v1902_v31  ;;  %2150 = vmatprep.subr.bf16.mxu0 %v2349_v25  ;;  %v2373_v25 = vld [vmem:[%s2847_s1 + $0x208] sm:$0xff]   ;;  %v1906_v31 = vcombine.low %v2666_v59, %v2673_v0  ;;  %v1212_v0 = vor.u32 %v1211_v53, %v1207_v42 }
  0x4f   : > { %2249 = vmatpush3.bf16.msra.mxu1 %v2346_v14  ;;  %2244 = vmatprep.mubr.bf16.mxu1 %v1905_v63  ;;  %v289_v14 = vshrl.u32 %v1788_v4, 16  ;;  %v1945_v63 = vld [vmem:[%s2495_s5 + $0x40] sm:$0xf]  ;;  %v1947_v4 = vld [vmem:[%s2495_s5 + $0x48] sm:$0xf] }
  0x50   : > { %2250 = vmatprep.subr.bf16.mxu1 %v2351_v32  ;;  %v1955_v12 = vcombine.low %v1945_v63, %v1946_v3 }
  0x51   : > { %2151 = vmatpush3.bf16.msra.mxu0 %v2350_v35  ;;  %v294_v23 = vor.u32 %v293_v20, %v289_v14  ;;  %v1938_v35 = vld [vmem:[%s2495_s5 + $0x24] sm:$0x1] }
  0x52   : > { %2152 = vmatprep.subr.bf16.mxu0 %v2353_v38  ;;  %v2722_v38 = vld [vmem:[%s2495_s5 + $0x28] sm:$0xf]  ;;  %v1951_v40 = vcombine.low %v2714_v34, %v1938_v35  ;;  %v1251_v29 = vshll.u32 %v1955_v12, 16  ;;  %v1249_v35 = vshrl.u32 %v1955_v12, 16 }
  0x53   : > { %2251 = vmatpush3.bf16.msra.mxu1 %v2351_v32  ;;  %v1907_v26 = vcombine.low %v287_v22, %v294_v23  ;;  %v1936_v32 = vld [vmem:[%s2495_s5 + $0x1c] sm:$0x1] }
  0x54   : > { %2252 = vmatprep.subr.bf16.mxu1 %v2355_v39  ;;  %1060 = vmatmul.mubr.bf16.gmra.mxu0 %v1900_v44  ;;  %v1950_v37 = vcombine.low %v2707_v30, %v1936_v32  ;;  %v1262_v44 = vrot.slane %v1949_v33, 1  ;;  %v1264_v51 = vrot.slane %v1951_v40, 1  ;;  %v1221_v55 = vshrl.u32 %v1951_v40, 16 }
  0x55   : > { %2153 = vmatpush3.bf16.msra.mxu0 %v2354_v47  ;;  %1067 = vmatprep.mubr.bf16.mxu0 %v1904_v13  ;;  %v1942_v47 = vld [vmem:[%s2495_s5 + $0x34] sm:$0x1]  ;;  %v1223_v56 = vshll.u32 %v1951_v40, 16  ;;  %v2008_v32 = vcombine.low %v2714_v34, %v2722_v38 }
  0x56   : > { %2154 = vmatprep.subr.bf16.mxu0 %v2356_v49  ;;  %2245 = vmatmul.mubr.bf16.gmra.mxu1 %v1908_v16  ;;  %v1214_v48 = vshrl.u32 %v1950_v37, 16  ;;  %v1216_v49 = vshll.u32 %v1950_v37, 16  ;;  %v1953_v7 = vcombine.low %v2731_v46, %v1942_v47 }
  0x57   : > { %2253 = vmatpush3.bf16.msra.mxu1 %v2355_v39  ;;  %v1940_v39 = vld [vmem:[%s2495_s5 + $0x2c] sm:$0x1]  ;;  %v1225_v2 = vrot.slane %v1223_v56, 1 }
  0x58   : > { %2254 = vmatprep.subr.bf16.mxu1 %v2358_v50  ;;  %v1952_v45 = vcombine.low %v2722_v38, %v1940_v39  ;;  %v1218_v59 = vrot.slane %v1216_v49, 1  ;;  %v1235_v16 = vshrl.u32 %v1953_v7, 16  ;;  %v1266_v20 = vrot.slane %v1953_v7, 1 }
  0x59   : > { %2155 = vmatpush3.bf16.msra.mxu0 %v2357_v57  ;;  %v1944_v57 = vld [vmem:[%s2495_s5 + $0x3c] sm:$0x1]  ;;  %v1226_v11 = vor.u32 %v1225_v2, %v1221_v55 }
  0x5a   : > { %2156 = vmatprep.subr.bf16.mxu0 %v2362_v62  ;;  %v1265_v54 = vrot.slane %v1952_v45, 1  ;;  %v1228_v61 = vshrl.u32 %v1952_v45, 16  ;;  %v1230_v62 = vshll.u32 %v1952_v45, 16  ;;  %v1219_v5 = vor.u32 %v1218_v59, %v1214_v48 }
  0x5b   : > { %2255 = vmatpush3.bf16.msra.mxu1 %v2358_v50  ;;  %v1263_v50 = vrot.slane %v1950_v37, 1  ;;  %v1253_v37 = vrot.slane %v1251_v29, 1  ;;  %v2014_v45 = vcombine.low %v1945_v63, %v1947_v4 }
  0x5c   : > { %2256 = vmatprep.subr.bf16.mxu1 %v2364_v6  ;;  %1068 = vmatmul.mubr.bf16.gmra.mxu0 %v1903_v8  ;;  %v1954_v8 = vcombine.low %v2735_v52, %v1944_v57  ;;  %v2010_v10 = vcombine.low %v1264_v51, %v1265_v54  ;;  %v2006_v14 = vcombine.low %v1212_v0, %v1219_v5 }
  0x5d   : > { %2157 = vmatpush3.bf16.msra.mxu0 %v2363_v9  ;;  %1075 = vmatprep.mubr.bf16.mxu0 %v1907_v26  ;;  %v2007_v60 = vcombine.low %v1262_v44, %v1263_v50  ;;  %v1948_v9 = vld [vmem:[%s2495_s5 + $0x4c] sm:$0x1]  ;;  %v1268_v26 = vrot.slane %v1955_v12, 1  ;;  %s2043_s5 = sshll.u32 %s2851_s13, 6 }
  0x5e   : > { %2158 = vmatprep.subr.bf16.mxu0 %v2367_v17  ;;  %v1956_v13 = vcombine.low %v1947_v4, %v1948_v9  ;;  %v1237_v17 = vshll.u32 %v1953_v7, 16  ;;  %v1242_v18 = vshrl.u32 %v1954_v8, 16  ;;  %s2805_s18 = scalar_lea.vmem %s2848_s2, %s2043_s5 }
  0x5f   : > { %2257 = vmatpush3.bf16.msra.mxu1 %v2364_v6  ;;  %2264 = vmatprep.mubr.bf16.mxu1 %v2007_v60  ;;  %v1232_v6 = vrot.slane %v1230_v62, 1 }
  0x60   : > { %2258 = vmatprep.subr.bf16.mxu1 %v2369_v19  ;;  %v1239_v23 = vrot.slane %v1237_v17, 1  ;;  %v1258_v30 = vshll.u32 %v1956_v13, 16  ;;  %v1256_v39 = vshrl.u32 %v1956_v13, 16 }
  0x61   : > { %2159 = vmatpush3.bf16.msra.mxu0 %v2368_v21  ;;  %v1233_v15 = vor.u32 %v1232_v6, %v1228_v61  ;;  %v1267_v21 = vrot.slane %v1954_v8, 1 }
  0x62   : > { %2160 = vmatprep.subr.bf16.mxu0 %v2371_v24  ;;  %v1240_v28 = vor.u32 %v1239_v23, %v1235_v16  ;;  %v1260_v40 = vrot.slane %v1258_v30, 1 }
  0x63   : > { %2259 = vmatpush3.bf16.msra.mxu1 %v2369_v19  ;;  %v1244_v19 = vshll.u32 %v1954_v8, 16  ;;  %v2009_v22 = vcombine.low %v1226_v11, %v1233_v15 }
  0x64   : > { %2260 = vmatprep.subr.bf16.mxu1 %v2373_v25  ;;  %1076 = vmatmul.mubr.bf16.gmra.mxu0 %v1906_v31  ;;  %v1261_v42 = vor.u32 %v1260_v40, %v1256_v39 }
  0x65   : > { %2161 = vmatpush3.bf16.msra.mxu0 %v2372_v27  ;;  %1535 = vmatprep.mubr.bf16.mxu0 %v2006_v14  ;;  %v1246_v24 = vrot.slane %v1244_v19, 1  ;;  %v1269_v27 = vrot.slane %v1956_v13, 1 }
  0x66   : > { %2162 = vmatprep.subr.bf16.mxu0 %v2374_v36 }
  0x67   : > { %2261 = vmatpush3.bf16.msra.mxu1 %v2373_v25  ;;  %v2013_v25 = vcombine.low %v1266_v20, %v1267_v21  ;;  %v1247_v31 = vor.u32 %v1246_v24, %v1242_v18  ;;  %v2016_v33 = vcombine.low %v1268_v26, %v1269_v27 }
  0x68   : > { %2262 = vmatprep.subr.bf16.mxu1 %v2376_v41 }
  0x69   : > { %2163 = vmatpush3.bf16.msra.mxu0 %v2375_v58  ;;  %v2012_v36 = vcombine.low %v1240_v28, %v1247_v31 }
  0x6b   : > { %2263 = vmatpush3.bf16.msra.mxu1 %v2376_v41  ;;  %v1254_v41 = vor.u32 %v1253_v37, %v1249_v35 }
  0x6c   : > { %1536 = vmatmul.mubr.bf16.vlgmr.msra.gmra.mxu0 %v2005_v1 }
  0x6d   : > { %1543 = vmatprep.mubr.bf16.mxu0 %v2009_v22  ;;  %v2015_v44 = vcombine.low %v1254_v41, %v1261_v42 }
  0x6e   : > { %2265 = vmatmul.mubr.bf16.vlgmr.msra.gmra.mxu1 %v2010_v10 }
  0x6f   : > { %2268 = vmatprep.mubr.bf16.mxu1 %v2013_v25 }
  0x74   : > { %1544 = vmatmul.mubr.bf16.gmra.mxu0 %v2008_v32 }
  0x75   : > { %1551 = vmatprep.mubr.bf16.mxu0 %v2012_v36 }
  0x76   : > { %2269 = vmatmul.mubr.bf16.gmra.mxu1 %v2016_v33 }
  0x7c   : > { %1552 = vmatmul.mubr.bf16.gmra.mxu0 %v2011_v43 }
  0x7d   : > { %1559 = vmatprep.mubr.bf16.mxu0 %v2015_v44 }
  0x84   : > { %1560 = vmatmul.mubr.bf16.gmra.mxu0 %v2014_v45 }
  0xec   : > { %v2060_v34 = vpop.f32.mrf.mxu0 }
  0xee   : > { %v2061_v38 = vpop.f32.mrf.mxu0  ;;  %v2753_v50 = vpop.f32.mrf.mxu1 }
  0xef   : > { %v2062_v24 = vadd.f32 %v2061_v38, %v2060_v34 }
  0xf0   : > { %v2063_v47 = vpop.f32.mrf.mxu0  ;;  %v820_v54 = vpop.f32.mrf.mxu1 }
  0xf1   : > { %v821_v29 = vadd.f32 %v2062_v24, %v820_v54 }
  0xf2   : > { %v2064_v48 = vpop.f32.mrf.mxu0  ;;  %v2759_v46 = vpop.f32.mrf.mxu1 }
  0xf3   : > { %v2065_v30 = vadd.f32 %v2064_v48, %v2063_v47 }
  0xf4   : > { %v2066_v49 = vpop.f32.mrf.mxu0  ;;  %v823_v58 = vpop.f32.mrf.mxu1 }
  0xf5   : > { %v824_v39 = vadd.f32 %v2065_v30, %v823_v58 }
  0xf6   : > { %v2067_v51 = vpop.f32.mrf.mxu0  ;;  %v2767_v60 = vpop.f32.mrf.mxu1 }
  0xf7   : > { %v2068_v40 = vadd.f32 %v2067_v51, %v2066_v49 }
  0xf8   : > { %v2755_v53 = vpop.f32.mrf.mxu0  ;;  %v2773_v63 = vpop.f32.mrf.mxu1 }
  0xf9   : > { %v829_v48 = vadd.f32 %v2753_v50, %v2068_v40 }
  0xfa   : > { %v2070_v55 = vpop.f32.mrf.mxu0  ;;  %v2779_v2 = vpop.f32.mrf.mxu1 }
  0xfb   : > { %v2071_v49 = vadd.f32 %v2070_v55, %v2755_v53 }
  0xfc   : > { %v2757_v56 = vpop.f32.mrf.mxu0  ;;  %v2781_v5 = vpop.f32.mrf.mxu1 }
  0xfd   : > { %v832_v24 = vadd.f32 %v2759_v46, %v2071_v49 }
  0xfe   : > { %v2761_v52 = vpop.f32.mrf.mxu0 }
 0x100   : > { %v2763_v57 = vpop.f32.mrf.mxu0 }
 0x102   : > { %v2765_v59 = vpop.f32.mrf.mxu0 }
 0x104   : > { %v2769_v61 = vpop.f32.mrf.mxu0 }
 0x106   : > { %v2771_v62 = vpop.f32.mrf.mxu0 }
 0x108   : > { %v2775_v0 = vpop.f32.mrf.mxu0 }
 0x10a   : > { %v2777_v1 = vpop.f32.mrf.mxu0 }
 0x10c   : > { %v2112_v3 = vpop.f32.mrf.mxu0 }
 0x10e   : > { %v2113_v4 = vpop.f32.mrf.mxu0  ;;  %v2242_v7 = vpop.f32.mrf.mxu1 }
 0x10f   : > { %v2114_v27 = vadd.f32 %v2113_v4, %v2112_v3 }
 0x110   : > { %v2115_v6 = vpop.f32.mrf.mxu0  ;;  %v1118_v10 = vpop.f32.mrf.mxu1 }
 0x111   : > { %v1054_v35 = vadd.f32 %v2114_v27, %v821_v29  ;;  %v2074_v27 = vadd.f32 %v2761_v52, %v2757_v56 }
 0x112   : > { %v2116_v8 = vpop.f32.mrf.mxu0  ;;  %v2783_v13 = vpop.f32.mrf.mxu1 }
 0x113   : > { %v2117_v33 = vadd.f32 %v2116_v8, %v2115_v6  ;;  %v1119_v44 = vadd.f32 %v1118_v10, %v1054_v35 }
 0x114   : > { %v2118_v9 = vpop.f32.mrf.mxu0  ;;  %v1121_v16 = vpop.f32.mrf.mxu1 }
 0x115   : > { %v1057_v34 = vadd.f32 %v2117_v33, %v824_v39 }
 0x116   : > { %v2119_v11 = vpop.f32.mrf.mxu0  ;;  %v2785_v18 = vpop.f32.mrf.mxu1 }
 0x117   : > { %v2120_v45 = vadd.f32 %v2119_v11, %v2118_v9  ;;  %v1122_v8 = vadd.f32 %v1121_v16, %v1057_v34 }
 0x118   : > { %v2121_v12 = vpop.f32.mrf.mxu0  ;;  %v2787_v21 = vpop.f32.mrf.mxu1 }
 0x119   : > { %v1062_v6 = vadd.f32 %v2120_v45, %v829_v48 }
 0x11a   : > { %v2122_v14 = vpop.f32.mrf.mxu0  ;;  %v2793_v25 = vpop.f32.mrf.mxu1 }
 0x11b   : > { %v2123_v9 = vadd.f32 %v2122_v14, %v2121_v12  ;;  %v1127_v55 = vadd.f32 %v2242_v7, %v1062_v6  ;;  %v837_v12 = vadd.f32 %v2074_v27, %v2773_v63  ;;  %v2077_v14 = vadd.f32 %v2765_v59, %v2763_v57 }
 0x11c   : > { %v2124_v15 = vpop.f32.mrf.mxu0  ;;  %v2799_v31 = vpop.f32.mrf.mxu1  ;;  %v2080_v63 = vadd.f32 %v2771_v62, %v2769_v61 }
 0x11e   : > { %v2125_v17 = vpop.f32.mrf.mxu0  ;;  %v845_v61 = vadd.f32 %v2767_v60, %v2080_v63 }
 0x11f   : > { %v2126_v33 = vadd.f32 %v2125_v17, %v2124_v15  ;;  %v840_v17 = vadd.f32 %v2077_v14, %v2781_v5 }
 0x120   : > { %v2127_v19 = vpop.f32.mrf.mxu0 }
 0x122   : > { %v2128_v20 = vpop.f32.mrf.mxu0 }
 0x123   : > { %v2129_v40 = vadd.f32 %v2128_v20, %v2127_v19  ;;  %v2083_v20 = vadd.f32 %v2777_v1, %v2775_v0 }
 0x124   : > { %v2789_v22 = vpop.f32.mrf.mxu0 }
 0x125   : > { %v848_v1 = vadd.f32 %v2779_v2, %v2083_v20 }
 0x126   : > { %v2791_v23 = vpop.f32.mrf.mxu0 }
 0x128   : > { %v2795_v26 = vpop.f32.mrf.mxu0 }
 0x12a   : > { %v2797_v28 = vpop.f32.mrf.mxu0 }
 0x12c   : > { %v2164_v32 = vpop.f32.mrf.mxu0 }
 0x12e   : > { %v2266_v36 = vpop.f32.mrf.mxu1  ;;  %v2165_v37 = vpop.f32.mrf.mxu0 }
 0x12f   : > { %v2166_v41 = vadd.f32 %v2165_v37, %v2164_v32  ;;  %v1065_v32 = vadd.f32 %v2123_v9, %v832_v24 }
 0x130   : > { %v1602_v42 = vpop.f32.mrf.mxu1  ;;  %v2167_v43 = vpop.f32.mrf.mxu0 }
 0x131   : > { %v1603_v38 = vadd.f32 %v2166_v41, %v1602_v42  ;;  %v1130_v52 = vadd.f32 %v2783_v13, %v1065_v32  ;;  %v1070_v41 = vadd.f32 %v2126_v33, %v837_v12  ;;  %v1073_v13 = vadd.f32 %v2129_v40, %v840_v17 }
 0x132   : > { %v2267_v3 = vpop.f32.mrf.mxu1  ;;  %v2168_v47 = vpop.f32.mrf.mxu0 }
 0x133   : > { %v1633_v51 = vadd.f32 %v1603_v38, %v1119_v44  ;;  %v2169_v54 = vadd.f32 %v2168_v47, %v2167_v43  ;;  %v1135_v43 = vadd.f32 %v2787_v21, %v1070_v41  ;;  %v2132_v44 = vadd.f32 %v2791_v23, %v2789_v22 }
 0x134   : > { %v1605_v58 = vpop.f32.mrf.mxu1  ;;  %v2170_v4 = vpop.f32.mrf.mxu0  ;;  %v2135_v38 = vadd.f32 %v2797_v28, %v2795_v26  ;;  %v1138_v48 = vadd.f32 %v2799_v31, %v1073_v13 }
 0x135   : > { %1641 = vst [vmem:[%s2805_s18] sm:$0xff] %v1633_v51  ;;  %v1606_v10 = vadd.f32 %v2169_v54, %v1605_v58  ;;  %v1662_v21 = vmul.f32 %v1633_v51, %v1633_v51  ;;  %v1078_v23 = vadd.f32 %v2132_v44, %v845_v61 }
 0x136   : > { %v2171_v11 = vpop.f32.mrf.mxu0  ;;  %v2270_v53 = vpop.f32.mrf.mxu1  ;;  %v1081_v26 = vadd.f32 %v2135_v38, %v848_v1 }
 0x137   : > { %v1634_v29 = vadd.f32 %v1606_v10, %v1122_v8  ;;  %v2172_v50 = vadd.f32 %v2171_v11, %v2170_v4  ;;  %v1143_v10 = vadd.f32 %v2785_v18, %v1078_v23 }
 0x138   : > { %v2173_v30 = vpop.f32.mrf.mxu0  ;;  %v1618_v56 = vpop.f32.mrf.mxu1 }
 0x139   : > { %1642 = vst [vmem:[%s2805_s18 + $0x8] sm:$0xff] %v1634_v29  ;;  %v1611_v35 = vadd.f32 %v2266_v36, %v2172_v50  ;;  %v1663_v5 = vmul.f32 %v1634_v29, %v1634_v29  ;;  %v1649_v49 = vadd.f32 %v1634_v29, %v1633_v51 }
 0x13a   : > { %v2174_v16 = vpop.f32.mrf.mxu0  ;;  %v2271_v59 = vpop.f32.mrf.mxu1 }
 0x13b   : > { %v1635_v46 = vadd.f32 %v1611_v35, %v1127_v55  ;;  %v2175_v37 = vadd.f32 %v2174_v16, %v2173_v30  ;;  %v1670_v54 = vadd.f32 %v1663_v5, %v1662_v21  ;;  %v1146_v55 = vadd.f32 %v2793_v25, %v1081_v26 }
 0x13c   : > { %v2176_v39 = vpop.f32.mrf.mxu0  ;;  %v1621_v47 = vpop.f32.mrf.mxu1 }
 0x13d   : > { %1643 = vst [vmem:[%s2805_s18 + $0x10] sm:$0xff] %v1635_v46  ;;  %v1614_v7 = vadd.f32 %v2267_v3, %v2175_v37  ;;  %v1664_v3 = vmul.f32 %v1635_v46, %v1635_v46  ;;  %v1650_v4 = vadd.f32 %v1649_v49, %v1635_v46 }
 0x13e   : > { %v2177_v15 = vpop.f32.mrf.mxu0 }
 0x13f   : > { %v1636_v36 = vadd.f32 %v1614_v7, %v1130_v52  ;;  %v2178_v42 = vadd.f32 %v2177_v15, %v2176_v39  ;;  %v1671_v28 = vadd.f32 %v1670_v54, %v1664_v3 }
 0x140   : > { %v2179_v57 = vpop.f32.mrf.mxu0 }
 0x141   : > { %1644 = vst [vmem:[%s2805_s18 + $0x18] sm:$0xff] %v1636_v36  ;;  %v1619_v19 = vadd.f32 %v2178_v42, %v1618_v56  ;;  %v1665_v60 = vmul.f32 %v1636_v36, %v1636_v36  ;;  %v1651_v11 = vadd.f32 %v1650_v4, %v1636_v36 }
 0x142   : > { %v2180_v45 = vpop.f32.mrf.mxu0 }
 0x143   : > { %v1637_v62 = vadd.f32 %v1619_v19, %v1135_v43  ;;  %v2181_v34 = vadd.f32 %v2180_v45, %v2179_v57  ;;  %v1672_v24 = vadd.f32 %v1671_v28, %v1665_v60 }
 0x144   : > { %v2182_v22 = vpop.f32.mrf.mxu0 }
 0x145   : > { %1645 = vst [vmem:[%s2805_s18 + $0x20] sm:$0xff] %v1637_v62  ;;  %v1622_v0 = vadd.f32 %v2181_v34, %v1621_v47  ;;  %v1666_v31 = vmul.f32 %v1637_v62, %v1637_v62  ;;  %v1652_v2 = vadd.f32 %v1651_v11, %v1637_v62 }
 0x146   : > { %v2183_v58 = vpop.f32.mrf.mxu0 }
 0x147   : > { %v1638_v6 = vadd.f32 %v1622_v0, %v1138_v48  ;;  %v2184_v8 = vadd.f32 %v2183_v58, %v2182_v22  ;;  %v1673_v32 = vadd.f32 %v1672_v24, %v1666_v31 }
 0x148   : > { %v2185_v9 = vpop.f32.mrf.mxu0 }
 0x149   : > { %1646 = vst [vmem:[%s2805_s18 + $0x28] sm:$0xff] %v1638_v6  ;;  %v1627_v51 = vadd.f32 %v2270_v53, %v2184_v8  ;;  %v1667_v29 = vmul.f32 %v1638_v6, %v1638_v6  ;;  %v1653_v33 = vadd.f32 %v1652_v2, %v1638_v6 }
 0x14a   : > { %v2186_v27 = vpop.f32.mrf.mxu0 }
 0x14b   : > { %v1639_v50 = vadd.f32 %v1627_v51, %v1143_v10  ;;  %v2187_v30 = vadd.f32 %v2186_v27, %v2185_v9  ;;  %v1674_v12 = vadd.f32 %v1673_v32, %v1667_v29 }
 0x14d   : > { %1647 = vst [vmem:[%s2805_s18 + $0x30] sm:$0xff] %v1639_v50  ;;  %v1668_v35 = vmul.f32 %v1639_v50, %v1639_v50  ;;  %v1630_v16 = vadd.f32 %v2271_v59, %v2187_v30  ;;  %v1654_v18 = vadd.f32 %v1653_v33, %v1639_v50 }
 0x14f   : > { %v1640_v14 = vadd.f32 %v1630_v16, %v1146_v55  ;;  %v1675_v46 = vadd.f32 %v1674_v12, %v1668_v35 }
 0x151   : > { %1648 = vst [vmem:[%s2805_s18 + $0x38] sm:$0xff] %v1640_v14  ;;  %v1655_v53 = vadd.f32 %v1654_v18, %v1640_v14  ;;  %v1669_v37 = vmul.f32 %v1640_v14, %v1640_v14 }
 0x153   : > { %v1656_v39 = vrot.slane %v1655_v53, 4  ;;  %v1676_v56 = vadd.f32 %v1675_v46, %v1669_v37 }
 0x155   : > { %v1657_v52 = vadd.f32 %v1656_v39, %v1655_v53  ;;  %v1677_v40 = vrot.slane %v1676_v56, 4 }
 0x157   : > { %v1658_v41 = vrot.slane %v1657_v52, 2  ;;  %v1678_v7 = vadd.f32 %v1677_v40, %v1676_v56 }
 0x159   : > { %v1659_v25 = vadd.f32 %v1658_v41, %v1657_v52  ;;  %v1679_v15 = vrot.slane %v1678_v7, 2 }
 0x15b   : > { %v1660_v17 = vrot.slane %v1659_v25, 1  ;;  %v1680_v63 = vadd.f32 %v1679_v15, %v1678_v7 }
 0x15d   : > { %v1681_v36 = vrot.slane %v1680_v63, 1  ;;  %v1661_v42 = vadd.f32 %v1660_v17, %v1659_v25 }
 0x15f   : > { %v1682_v57 = vadd.f32 %v1681_v36, %v1680_v63 }
 0x161   : > { %v1684_v59 = vsel %vm1683_vm0, %v1661_v42, %v1682_v57 }
 0x162   : > { %1685 = vst [vmem:[%s181_s22] sm:$0x3] %v1684_v59 }
 0x163 PF: > { %s14_s12 = sadd.s32 1, %s2395_s12  }
 0x164   : > { %p11_p4 = scmp.ge.s32.totalorder %s14_s12, 4  }
 0x166   :  { %13 = sbr.rel (!%p11_p4) target bundleno = 1 (0x1), region = 74 }

// kernel: res_block_forward.4
= control target key start
LH: loop header
LB: loop body
LE: loop exit
PB: predicated region body
PF: predicated region fallthrough
CT: control target
= control target key end

     0   :  { %s2816_s21 = smov 0   ;;  %s3383_s0 = inlined_call_operand.vmem [shape: f32[2,64,128], index: 0, kind: input, shape index: {}]   ;;  %s3384_s1 = inlined_call_operand.vmem [shape: f32[1,128], index: 1, kind: input, shape index: {}]   ;;  %s3385_s2 = inlined_call_operand.vmem [shape: f32[1,128], index: 2, kind: input, shape index: {}]   ;;  %s3386_s3 = inlined_call_operand.vmem [shape: bf16[3,384,128], index: 3, kind: input, shape index: {}]   ;;  %s3387_s4 = inlined_call_operand.vmem [shape: f32[2,64,128], index: 4, kind: output, shape index: {0}]   ;;  %s3388_s5 = inlined_call_operand.vmem [shape: f32[2,64,128], index: 5, kind: output, shape index: {1}]   ;;  %s3389_s6 = inlined_call_operand.vmem [shape: f32[2,2,128], index: 6, kind: output, shape index: {2}]  }
   0x1 LB: > { %s2164_s22 = sadd.s32 4294967295, %s2778_s21   ;;  %p2168_p0 = scmp.ge.s32.totalorder %s2778_s21, 1  ;;  %s2778_s21 = sphi %s2816_s21, %s17_s21  }
   0x2   : > { %p217_p1 = scmp.lt.s32.totalorder %s2778_s21, 3 }
   0x4   : > { %p218_p2 = pnand %p2168_p0, %p217_p1 }
   0x6   : > { %221 = sbr.rel (%p218_p2) target bundleno = 380 (0x17c), region = 36 }
   0xb   : > { %v2664_v0 = vld [vmem:[%s3386_s3 + $0x138] sm:$0xff]   ;;  %v2667_v3 = vld [vmem:[%s3386_s3 + $0x130] sm:$0xff]   ;;  %v2670_v6 = vld [vmem:[%s3386_s3 + $0x128] sm:$0xff]   ;;  %v2780_v7 = vmov 0   ;;  %p256_p3 = scmp.lt.s32.totalorder %s2164_s22, 1  ;;  %vm360_vm0 = vcmask 1040384  }
   0xc   : > { %v2665_v1 = vld [vmem:[%s3386_s3 + $0xf8] sm:$0xff]   ;;  %2427 = vmatprep.subr.bf16.mxu0 %v2664_v0  ;;  %v2668_v4 = vld [vmem:[%s3386_s3 + $0xf0] sm:$0xff]   ;;  %354 = vst [vmem:[#allocation2] sm:$0xf] %v2780_v7  ;;  %355 = vst [vmem:[#allocation2 + $0x4] sm:$0x1] %v2780_v7 }
   0xd   : > { %v2666_v2 = vld [vmem:[%s3386_s3 + $0x178] sm:$0xff]   ;;  %2428 = vmatpush3.bf16.msra.mxu0 %v2665_v1  ;;  %v2669_v5 = vld [vmem:[%s3386_s3 + $0x170] sm:$0xff]   ;;  %357 = vst [vmem:[#allocation2 + $0x48] sm:$0xf] %v2780_v7  ;;  %358 = vst [vmem:[#allocation2 + $0x4c] sm:$0x1] %v2780_v7 }
   0xe   : > { %2583 = vmatprep.subr.bf16.mxu1 %v2666_v2  ;;  %2429 = vmatprep.subr.bf16.mxu0 %v2667_v3  ;;  %v2671_v8 = vld [vmem:[%s3386_s3 + $0xe8] sm:$0xff]   ;;  %v2673_v10 = vld [vmem:[%s3386_s3 + $0x120] sm:$0xff]   ;;  %v2676_v13 = vld [vmem:[%s3386_s3 + $0x118] sm:$0xff]   ;;  %s3399_s22 = smov (!%p256_p3, %s2164_s22), 1  ;;  %vm361_vm1 = vsmask.f32 256 }
   0xf   : > { %2584 = vmatpush3.bf16.msra.mxu1 %v2666_v2  ;;  %v2672_v9 = vld [vmem:[%s3386_s3 + $0x168] sm:$0xff]   ;;  %v2674_v11 = vld [vmem:[%s3386_s3 + $0xe0] sm:$0xff]   ;;  %v2678_v14 = vld [vmem:[%s3386_s3 + $0x158] sm:$0xff]   ;;  %s2882_s11 = sshll.u32 %s3399_s22, 6  ;;  %vm387_vm3 = vsmask.f32 7938 }
  0x10   : > { %2585 = vmatprep.subr.bf16.mxu1 %v2669_v5  ;;  %v2675_v12 = vld [vmem:[%s3386_s3 + $0x160] sm:$0xff]   ;;  %v2677_v15 = vld [vmem:[%s3386_s3 + $0xd8] sm:$0xff]   ;;  %v2679_v16 = vld [vmem:[%s3386_s3 + $0x110] sm:$0xff]   ;;  %s2897_s20 = scalar_lea.vmem %s3383_s0, %s2882_s11  ;;  %s2948_s14 = scalar_lea.vmem %s3387_s4, %s2882_s11  ;;  %vm493_vm5 = vcmask 1043456  }
  0x11   : > { %2430 = vmatpush3.bf16.msra.mxu0 %v2668_v4  ;;  %v2681_v17 = vld [vmem:[%s3386_s3 + $0x150] sm:$0xff]   ;;  %v2682_v19 = vld [vmem:[%s3386_s3 + $0x108] sm:$0xff]   ;;  %v2685_v22 = vld [vmem:[%s3386_s3 + $0x100] sm:$0xff]   ;;  %s3339_s7 = scalar_lea.vmem %s3388_s5, %s2882_s11  ;;  %s2175_s11 = sshll.u32 %s3399_s22, 1 }
  0x12   : > { %2431 = vmatprep.subr.bf16.mxu0 %v2670_v6  ;;  %v2680_v18 = vld [vmem:[%s3386_s3 + $0xd0] sm:$0xff]   ;;  %v2683_v20 = vld [vmem:[%s3386_s3 + $0xc8] sm:$0xff]   ;;  %v2687_v23 = vld [vmem:[%s3386_s3 + $0x140] sm:$0xff]   ;;  %s274_s10 = scalar_lea.vmem %s3389_s6, %s2175_s11 }
  0x13   : > { %2586 = vmatpush3.bf16.msra.mxu1 %v2669_v5  ;;  %v2684_v21 = vld [vmem:[%s3386_s3 + $0x148] sm:$0xff]   ;;  %v276_v24 = vld [vmem:[%s2897_s20] sm:$0xff]  ;;  %vm2926_vm2 = vmand %vm360_vm0, %vm361_vm1 }
  0x14   : > { %2587 = vmatprep.subr.bf16.mxu1 %v2672_v9  ;;  %v277_v25 = vld [vmem:[%s2897_s20 + $0x8] sm:$0xff]  ;;  %v2913_v26 = vld [vmem:[%s3384_s1] ss:$0 sm:$0xff]  ;;  %v366_v34 = vld [vmem:[#allocation2 + $0x10] sm:$0x1] }
  0x15   : > { %2432 = vmatpush3.bf16.msra.mxu0 %v2671_v8  ;;  %v2686_v27 = vld [vmem:[%s3386_s3 + $0xc0] sm:$0xff]   ;;  %v291_v28 = vmul.f32 %v2913_v26, %v276_v24  ;;  %v292_v29 = vmul.f32 %v2913_v26, %v277_v25  ;;  %v363_v32 = vld [vmem:[#allocation2 + $0x8] sm:$0x1]  ;;  %vm2934_vm4 = vmand %vm360_vm0, %vm387_vm3  ;;  %v367_v39 = vsel %vm2926_vm2, 0, %v366_v34 }
  0x16   : > { %2433 = vmatprep.subr.bf16.mxu0 %v2673_v10  ;;  %v2923_v30 = vld [vmem:[%s3385_s2] ss:$0 sm:$0xff]  ;;  %v364_v33 = vsel %vm2926_vm2, 0, %v363_v32  ;;  %v389_v36 = vld [vmem:[#allocation2 + $0xc] sm:$0x1]  ;;  %v2690_v43 = vld [vmem:[%s3386_s3 + $0x78] sm:$0xff]  }
  0x17   : > { %2588 = vmatpush3.bf16.msra.mxu1 %v2672_v9  ;;  %v306_v37 = vadd.f32 %v2923_v30, %v291_v28  ;;  %v307_v38 = vadd.f32 %v2923_v30, %v292_v29  ;;  %365 = vst [vmem:[#allocation2 + $0x8] sm:$0x1] %v364_v33  ;;  %v390_v40 = vsel %vm2934_vm4, 0, %v389_v36  ;;  %v392_v41 = vld [vmem:[#allocation2 + $0x14] sm:$0x1]  ;;  %v279_v47 = vld [vmem:[%s2897_s20 + $0x18] sm:$0xff]  ;;  %vm2979_vm6 = vmand %vm493_vm5, %vm387_vm3 }
  0x18   : > { %2589 = vmatprep.subr.bf16.mxu1 %v2675_v12  ;;  %368 = vst [vmem:[#allocation2 + $0x10] sm:$0x1] %v367_v39  ;;  %391 = vst [vmem:[#allocation2 + $0xc] sm:$0x1] %v390_v40  ;;  %v393_v42 = vsel %vm2934_vm4, 0, %v392_v41  ;;  %v278_v46 = vld [vmem:[%s2897_s20 + $0x10] sm:$0xff]  ;;  %v294_v53 = vmul.f32 %v2913_v26, %v279_v47 }
  0x19   : > { %2434 = vmatpush3.bf16.msra.mxu0 %v2674_v11  ;;  %v314_v44 = vmax.f32 %v306_v37, 0.0  ;;  %v315_v45 = vmax.f32 %v307_v38, 0.0  ;;  %394 = vst [vmem:[#allocation2 + $0x14] sm:$0x1] %v393_v42  ;;  %v293_v48 = vmul.f32 %v2913_v26, %v278_v46  ;;  %v369_v49 = vld [vmem:[#allocation2 + $0x18] sm:$0x1] }
  0x1a   : > { %2435 = vmatprep.subr.bf16.mxu0 %v2676_v13  ;;  %v372_v50 = vld [vmem:[#allocation2 + $0x20] sm:$0x1]  ;;  %v370_v54 = vsel %vm2926_vm2, 0, %v369_v49  ;;  %v395_v55 = vld [vmem:[#allocation2 + $0x1c] sm:$0x1]  ;;  %v309_v3 = vadd.f32 %v2923_v30, %v294_v53  ;;  %v2717_v9 = vld [vmem:[%s3386_s3 + $0x48] sm:$0xff]  }
  0x1b   : > { %2590 = vmatpush3.bf16.msra.mxu1 %v2675_v12  ;;  %322 = vst [vmem:[%s2948_s14] sm:$0xff] %v314_v44  ;;  %323 = vst [vmem:[%s2948_s14 + $0x8] sm:$0xff] %v315_v45  ;;  %v2419_v51 = vpack.c.bf16 %v314_v44, %v314_v44  ;;  %v2420_v52 = vpack.c.bf16 %v315_v45, %v315_v45  ;;  %v398_v56 = vld [vmem:[#allocation2 + $0x24] sm:$0x1]  ;;  %v2966_v57 = vld [vmem:[%s3386_s3 + $0xb8] sm:$0xff]   ;;  %v308_v58 = vadd.f32 %v2923_v30, %v293_v48 }
  0x1c   : > { %2591 = vmatprep.subr.bf16.mxu1 %v2678_v14  ;;  %371 = vst [vmem:[#allocation2 + $0x18] sm:$0x1] %v370_v54  ;;  %v373_v59 = vsel %vm2926_vm2, 0, %v372_v50  ;;  %v396_v60 = vsel %vm2934_vm4, 0, %v395_v55  ;;  %v399_v61 = vsel %vm2934_vm4, 0, %v398_v56  ;;  %v317_v11 = vmax.f32 %v309_v3, 0.0 }
  0x1d   : > { %2436 = vmatpush3.bf16.msra.mxu0 %v2677_v15  ;;  %v414_v62 = vshrl.u32 %v2419_v51, 16  ;;  %v417_v63 = vshll.u32 %v2419_v51, 16  ;;  %v422_v0 = vshrl.u32 %v2420_v52, 16  ;;  %v425_v1 = vshll.u32 %v2420_v52, 16  ;;  %374 = vst [vmem:[#allocation2 + $0x20] sm:$0x1] %v373_v59 }
  0x1e   : > { %2437 = vmatprep.subr.bf16.mxu0 %v2679_v16  ;;  %397 = vst [vmem:[#allocation2 + $0x1c] sm:$0x1] %v396_v60  ;;  %400 = vst [vmem:[#allocation2 + $0x24] sm:$0x1] %v399_v61  ;;  %v495_v2 = vld [vmem:[#allocation2 + $0x8] sm:$0xf] }
  0x1f   : > { %2592 = vmatpush3.bf16.msra.mxu1 %v2678_v14  ;;  %v316_v4 = vmax.f32 %v308_v58, 0.0  ;;  %v416_v5 = vrot.slane %v414_v62, 7  ;;  %v424_v6 = vrot.slane %v422_v0, 7  ;;  %v498_v7 = vld [vmem:[#allocation2 + $0xc] sm:$0x1]  ;;  %325 = vst [vmem:[%s2948_s14 + $0x18] sm:$0xff] %v317_v11 }
  0x20   : > { %2593 = vmatprep.subr.bf16.mxu1 %v2681_v17  ;;  %v501_v8 = vld [vmem:[#allocation2 + $0x10] sm:$0xf]  ;;  %v504_v10 = vld [vmem:[#allocation2 + $0x14] sm:$0x1]  ;;  %v280_v44 = vld [vmem:[%s2897_s20 + $0x20] sm:$0xff] }
  0x21   : > { %2438 = vmatpush3.bf16.msra.mxu0 %v2680_v18  ;;  %324 = vst [vmem:[%s2948_s14 + $0x10] sm:$0xff] %v316_v4  ;;  %v2421_v12 = vpack.c.bf16 %v316_v4, %v316_v4  ;;  %v419_v13 = vor.u32 %v417_v63, %v416_v5  ;;  %v420_v14 = vrot.slane %v416_v5, 4  ;;  %v427_v15 = vor.u32 %v425_v1, %v424_v6  ;;  %v281_v51 = vld [vmem:[%s2897_s20 + $0x28] sm:$0xff]  ;;  %v378_v58 = vld [vmem:[#allocation2 + $0x30] sm:$0x1]  ;;  %v2703_v35 = vld [vmem:[%s3386_s3 + $0x60] sm:$0xff]  }
  0x22   : > { %2439 = vmatprep.subr.bf16.mxu0 %v2682_v19  ;;  %v428_v16 = vrot.slane %v424_v6, 4  ;;  %v295_v48 = vmul.f32 %v2913_v26, %v280_v44  ;;  %v375_v52 = vld [vmem:[#allocation2 + $0x28] sm:$0x1]  ;;  %v296_v54 = vmul.f32 %v2913_v26, %v281_v51  ;;  %v401_v59 = vld [vmem:[#allocation2 + $0x2c] sm:$0x1]  ;;  %v379_v63 = vsel %vm2926_vm2, 0, %v378_v58 }
  0x23   : > { %2594 = vmatpush3.bf16.msra.mxu1 %v2681_v17  ;;  %v2422_v17 = vpack.c.bf16 %v317_v11, %v317_v11  ;;  %v430_v18 = vshrl.u32 %v2421_v12, 16  ;;  %v433_v19 = vshll.u32 %v2421_v12, 16  ;;  %v507_v28 = vld [vmem:[#allocation2 + $0x18] sm:$0xf]  ;;  %v376_v56 = vsel %vm2926_vm2, 0, %v375_v52 }
  0x24   : > { %2595 = vmatprep.subr.bf16.mxu1 %v2684_v21  ;;  %v513_v32 = vld [vmem:[#allocation2 + $0x20] sm:$0xf]  ;;  %v310_v55 = vadd.f32 %v2923_v30, %v295_v48  ;;  %377 = vst [vmem:[#allocation2 + $0x28] sm:$0x1] %v376_v56  ;;  %v404_v0 = vld [vmem:[#allocation2 + $0x34] sm:$0x1]  ;;  %v311_v4 = vadd.f32 %v2923_v30, %v296_v54 }
  0x25   : > { %2440 = vmatpush3.bf16.msra.mxu0 %v2683_v20  ;;  %v496_v20 = vsel %vm2979_vm6, %v419_v13, %v495_v2  ;;  %v432_v24 = vrot.slane %v430_v18, 7  ;;  %v438_v25 = vshrl.u32 %v2422_v17, 16  ;;  %v510_v29 = vld [vmem:[#allocation2 + $0x1c] sm:$0x1]  ;;  %v516_v37 = vld [vmem:[#allocation2 + $0x24] sm:$0x1] }
  0x26   : > { %2441 = vmatprep.subr.bf16.mxu0 %v2685_v22  ;;  %v502_v22 = vsel %vm2979_vm6, %v427_v15, %v501_v8  ;;  %497 = vst [vmem:[#allocation2 + $0x8] sm:$0xf] %v496_v20  ;;  %380 = vst [vmem:[#allocation2 + $0x30] sm:$0x1] %v379_v63  ;;  %v405_v20 = vsel %vm2934_vm4, 0, %v404_v0  ;;  %v2699_v63 = vld [vmem:[%s3386_s3 + $0x68] sm:$0xff]  }
  0x27   : > { %2596 = vmatpush3.bf16.msra.mxu1 %v2684_v21  ;;  %v499_v21 = vsel %vm2926_vm2, %v420_v14, %v498_v7  ;;  %503 = vst [vmem:[#allocation2 + $0x10] sm:$0xf] %v502_v22  ;;  %v435_v33 = vor.u32 %v433_v19, %v432_v24  ;;  %v436_v34 = vrot.slane %v432_v24, 4  ;;  %v440_v36 = vrot.slane %v438_v25, 7  ;;  %v2692_v22 = vld [vmem:[%s3386_s3 + $0x38] sm:$0xff]  }
  0x28   : > { %2597 = vmatprep.subr.bf16.mxu1 %v2687_v23  ;;  %500 = vst [vmem:[#allocation2 + $0xc] sm:$0x1] %v499_v21  ;;  %v319_v14 = vmax.f32 %v311_v4, 0.0  ;;  %v402_v19 = vsel %vm2934_vm4, 0, %v401_v59  ;;  %406 = vst [vmem:[#allocation2 + $0x34] sm:$0x1] %v405_v20 }
  0x29   : > { %2442 = vmatpush3.bf16.msra.mxu0 %v2686_v27  ;;  %v441_v27 = vshll.u32 %v2422_v17, 16  ;;  %v444_v39 = vrot.slane %v440_v36, 4  ;;  %v508_v40 = vsel %vm2979_vm6, %v435_v33, %v507_v28  ;;  %v511_v41 = vsel %vm2926_vm2, %v436_v34, %v510_v29  ;;  %403 = vst [vmem:[#allocation2 + $0x2c] sm:$0x1] %v402_v19  ;;  %v282_v34 = vld [vmem:[%s2897_s20 + $0x30] sm:$0xff] }
  0x2a   : > { %2479 = vmatprep.subr.bf16.mxu0 %v2690_v43  ;;  %509 = vst [vmem:[#allocation2 + $0x18] sm:$0xf] %v508_v40  ;;  %512 = vst [vmem:[#allocation2 + $0x1c] sm:$0x1] %v511_v41  ;;  %v297_v54 = vmul.f32 %v2913_v26, %v282_v34  ;;  %v410_v56 = vld [vmem:[#allocation2 + $0x44] sm:$0x1] }
  0x2b   : > { %2598 = vmatpush3.bf16.msra.mxu1 %v2687_v23  ;;  %v505_v23 = vsel %vm2926_vm2, %v428_v16, %v504_v10  ;;  %v443_v38 = vor.u32 %v441_v27, %v440_v36  ;;  %v517_v43 = vsel %vm2926_vm2, %v444_v39, %v516_v37  ;;  %v318_v10 = vmax.f32 %v310_v55, 0.0  ;;  %327 = vst [vmem:[%s2948_s14 + $0x28] sm:$0xff] %v319_v14  ;;  %v2696_v27 = vld [vmem:[%s3386_s3 + $0x70] sm:$0xff]   ;;  %v381_v36 = vld [vmem:[#allocation2 + $0x38] sm:$0x1] }
  0x2c   : > { %2607 = vmatprep.subr.bf16.mxu1 %v2966_v57  ;;  %506 = vst [vmem:[#allocation2 + $0x14] sm:$0x1] %v505_v23  ;;  %518 = vst [vmem:[#allocation2 + $0x24] sm:$0x1] %v517_v43  ;;  %v3043_v39 = vld [vmem:[%s3386_s3 + $0xb0] sm:$0xff]   ;;  %v2713_v34 = vld [vmem:[%s3386_s3 + $0x98] sm:$0xff]  }
  0x2d   : > { %v514_v42 = vsel %vm2979_vm6, %v443_v38, %v513_v32  ;;  %v3002_v45 = vld [vmem:[#allocation2 + $0x8] sm:$0xf]  ;;  %326 = vst [vmem:[%s2948_s14 + $0x20] sm:$0xff] %v318_v10  ;;  %v2423_v18 = vpack.c.bf16 %v318_v10, %v318_v10  ;;  %v2424_v32 = vpack.c.bf16 %v319_v14, %v319_v14  ;;  %v384_v43 = vld [vmem:[#allocation2 + $0x40] sm:$0x1] }
  0x2e   : > { %v3004_v47 = vld [vmem:[#allocation2 + $0x10] sm:$0xf]  ;;  %515 = vst [vmem:[#allocation2 + $0x20] sm:$0xf] %v514_v42  ;;  %v283_v42 = vld [vmem:[%s2897_s20 + $0x38] sm:$0xff]  ;;  %v385_v10 = vsel %vm2926_vm2, 0, %v384_v43 }
  0x2f   : > { %v728_v46 = vld [vmem:[#allocation2 + $0xc] sm:$0x1]  ;;  %v2250_v6 = vcombine.low %v3002_v45, %v3004_v47  ;;  %v446_v33 = vshrl.u32 %v2423_v18, 16  ;;  %v519_v48 = vld [vmem:[#allocation2 + $0x28] sm:$0xf]  ;;  %v457_v52 = vshll.u32 %v2424_v32, 16  ;;  %v298_v0 = vmul.f32 %v2913_v26, %v283_v42 }
  0x30   : > { %v2194_v50 = vcombine.low %v3002_v45, %v728_v46  ;;  %v449_v46 = vshll.u32 %v2423_v18, 16  ;;  %v407_v55 = vld [vmem:[#allocation2 + $0x3c] sm:$0x1]  ;;  %386 = vst [vmem:[#allocation2 + $0x40] sm:$0x1] %v385_v10  ;;  %v411_v18 = vsel %vm2934_vm4, 0, %v410_v56 }
  0x31   : > { %v3019_v7 = vld [vmem:[#allocation2 + $0x18] sm:$0xf]  ;;  %v732_v8 = vld [vmem:[#allocation2 + $0x1c] sm:$0x1]  ;;  %v448_v45 = vrot.slane %v446_v33, 7 }
  0x32   : > { %v784_v60 = vshrl.u32 %v2194_v50, 16  ;;  %v786_v61 = vshll.u32 %v2194_v50, 16  ;;  %v839_v62 = vrot.slane %v2194_v50, 1  ;;  %v2196_v13 = vcombine.low %v3019_v7, %v732_v8  ;;  %v2697_v50 = vld [vmem:[%s3386_s3 + $0x30] sm:$0xff]   ;;  %412 = vst [vmem:[#allocation2 + $0x44] sm:$0x1] %v411_v18 }
  0x33   : > { %v730_v49 = vld [vmem:[#allocation2 + $0x14] sm:$0x1]  ;;  %v734_v17 = vld [vmem:[#allocation2 + $0x24] sm:$0x1]  ;;  %v451_v59 = vor.u32 %v449_v46, %v448_v45 }
  0x34   : > { %v2195_v53 = vcombine.low %v3004_v47, %v730_v49  ;;  %v788_v5 = vrot.slane %v786_v61, 1  ;;  %v841_v24 = vrot.slane %v2196_v13, 1  ;;  %v798_v25 = vshrl.u32 %v2196_v13, 16  ;;  %v528_v8 = vld [vmem:[#allocation2 + $0x34] sm:$0x1] }
  0x35   : > { %v3022_v16 = vld [vmem:[#allocation2 + $0x20] sm:$0xf]  ;;  %v800_v28 = vshll.u32 %v2196_v13, 16  ;;  %v454_v47 = vshrl.u32 %v2424_v32, 16 }
  0x36   : > { %v791_v1 = vshrl.u32 %v2195_v53, 16  ;;  %v793_v2 = vshll.u32 %v2195_v53, 16  ;;  %v840_v3 = vrot.slane %v2195_v53, 1  ;;  %v789_v15 = vor.u32 %v788_v5, %v784_v60  ;;  %v525_v53 = vld [vmem:[#allocation2 + $0x30] sm:$0xf] }
  0x37   : > { %v2197_v23 = vcombine.low %v3022_v16, %v734_v17  ;;  %v2253_v29 = vcombine.low %v3019_v7, %v3022_v16  ;;  %v802_v44 = vrot.slane %v800_v28, 1  ;;  %v452_v60 = vrot.slane %v448_v45, 4  ;;  %v2710_v45 = vld [vmem:[%s3386_s3 + $0x18] sm:$0xff]  }
  0x38   : > { %v795_v11 = vrot.slane %v793_v2, 1  ;;  %v2252_v12 = vcombine.low %v839_v62, %v840_v3  ;;  %v456_v61 = vrot.slane %v454_v47, 7  ;;  %v382_v2 = vsel %vm2926_vm2, 0, %v381_v36 }
  0x39   : > { %v842_v38 = vrot.slane %v2197_v23, 1  ;;  %v805_v40 = vshrl.u32 %v2197_v23, 16  ;;  %v807_v41 = vshll.u32 %v2197_v23, 16  ;;  %v803_v58 = vor.u32 %v802_v44, %v798_v25  ;;  %383 = vst [vmem:[#allocation2 + $0x38] sm:$0x1] %v382_v2  ;;  %v2704_v25 = vld [vmem:[%s3386_s3 + $0x20] sm:$0xff]  }
  0x3a   : > { %v796_v21 = vor.u32 %v795_v11, %v791_v1  ;;  %2599 = vmatprep.mubr.bf16.mxu1 %v2252_v12  ;;  %v312_v1 = vadd.f32 %v2923_v30, %v297_v54  ;;  %v459_v3 = vor.u32 %v457_v52, %v456_v61  ;;  %v460_v4 = vrot.slane %v456_v61, 4  ;;  %v2702_v11 = vld [vmem:[%s3386_s3 + $0xa8] sm:$0xff]  }
  0x3b   : > { %v2255_v49 = vcombine.low %v841_v24, %v842_v38  ;;  %v809_v51 = vrot.slane %v807_v41, 1  ;;  %v520_v5 = vsel %vm2979_vm6, %v451_v59, %v519_v48  ;;  %v313_v12 = vadd.f32 %v2923_v30, %v298_v0  ;;  %v2701_v30 = vld [vmem:[%s3386_s3 + $0x28] sm:$0xff]   ;;  %v540_v48 = vld [vmem:[#allocation2 + $0x44] sm:$0x1]  ;;  %v2716_v59 = vld [vmem:[%s3386_s3 + $0x90] sm:$0xff]  }
  0x3c   : > { %v2251_v37 = vcombine.low %v789_v15, %v796_v21  ;;  %521 = vst [vmem:[#allocation2 + $0x28] sm:$0xf] %v520_v5  ;;  %v320_v13 = vmax.f32 %v312_v1, 0.0  ;;  %v526_v14 = vsel %vm2979_vm6, %v459_v3, %v525_v53  ;;  %v529_v15 = vsel %vm2926_vm2, %v460_v4, %v528_v8  ;;  %v2705_v21 = vld [vmem:[%s3386_s3 + $0xa0] sm:$0xff]   ;;  %v2714_v53 = vld [vmem:[%s3386_s3 + $0x50] sm:$0xff]  }
  0x3d   : > { %2600 = vmatmul.mubr.bf16.vlgmr.msra.gmra.mxu1 %v2255_v49  ;;  %v810_v62 = vor.u32 %v809_v51, %v805_v40  ;;  %v408_v17 = vsel %vm2934_vm4, 0, %v407_v55  ;;  %527 = vst [vmem:[#allocation2 + $0x30] sm:$0xf] %v526_v14  ;;  %530 = vst [vmem:[#allocation2 + $0x34] sm:$0x1] %v529_v15  ;;  %v321_v19 = vmax.f32 %v313_v12, 0.0 }
  0x3e   : > { %1112 = vmatprep.mubr.bf16.mxu0 %v2251_v37  ;;  %2608 = vmatpush3.bf16.msra.mxu1 %v2966_v57  ;;  %328 = vst [vmem:[%s2948_s14 + $0x30] sm:$0xff] %v320_v13  ;;  %v2425_v20 = vpack.c.bf16 %v320_v13, %v320_v13  ;;  %409 = vst [vmem:[#allocation2 + $0x3c] sm:$0x1] %v408_v17  ;;  %v2715_v0 = vld [vmem:[%s3386_s3 + $0x10] sm:$0xff]   ;;  %v544_v1 = vld [vmem:[#allocation2 + $0x4] sm:$0x1] }
  0x3f   : > { %1113 = vmatmul.mubr.bf16.vlgmr.msra.gmra.mxu0 %v2250_v6  ;;  %v522_v6 = vld [vmem:[#allocation2 + $0x2c] sm:$0x1]  ;;  %2609 = vmatprep.subr.bf16.mxu1 %v3043_v39  ;;  %v2254_v26 = vcombine.low %v803_v58, %v810_v62  ;;  %329 = vst [vmem:[%s2948_s14 + $0x38] sm:$0xff] %v321_v19  ;;  %v3129_v2 = vld [vmem:[#allocation2 + $0x8] sm:$0xf]  ;;  %v2721_v12 = vld [vmem:[%s3386_s3 + $0x40] sm:$0xff]  }
  0x40   : > { %2480 = vmatpush3.bf16.msra.mxu0 %v2692_v22  ;;  %v523_v57 = vsel %vm2926_vm2, %v452_v60, %v522_v6  ;;  %v2426_v22 = vpack.c.bf16 %v321_v19, %v321_v19  ;;  %v462_v23 = vshrl.u32 %v2425_v20, 16  ;;  %v465_v24 = vshll.u32 %v2425_v20, 16  ;;  %v531_v16 = vld [vmem:[#allocation2 + $0x38] sm:$0xf]  ;;  %v3120_v60 = vld [vmem:[#allocation2] sm:$0xf] }
  0x41   : > { %2481 = vmatprep.subr.bf16.mxu0 %v2696_v27  ;;  %524 = vst [vmem:[#allocation2 + $0x2c] sm:$0x1] %v523_v57  ;;  %1120 = vmatprep.mubr.bf16.mxu0 %v2254_v26  ;;  %v2708_v27 = vld [vmem:[%s3386_s3 + $0x58] sm:$0xff]   ;;  %v546_v5 = vld [vmem:[#allocation2 + $0xc] sm:$0x1]  ;;  %v2186_v31 = vcombine.low %v3120_v60, %v544_v1  ;;  %v2723_v17 = vld [vmem:[%s3386_s3 + $0x80] sm:$0xff]  }
  0x42   : > { %2610 = vmatpush3.bf16.msra.mxu1 %v3043_v39  ;;  %v464_v28 = vrot.slane %v462_v23, 7  ;;  %v470_v32 = vshrl.u32 %v2426_v22, 16  ;;  %v473_v33 = vshll.u32 %v2426_v22, 16  ;;  %v537_v39 = vld [vmem:[#allocation2 + $0x40] sm:$0xf]  ;;  %v2187_v8 = vcombine.low %v3129_v2, %v546_v5  ;;  %v2720_v26 = vld [vmem:[%s3386_s3 + $0x88] sm:$0xff]  }
  0x43   : > { %2611 = vmatprep.subr.bf16.mxu1 %v2702_v11  ;;  %v3101_v7 = vld [vmem:[#allocation2 + $0x28] sm:$0xf]  ;;  %v602_v13 = vshll.u32 %v2186_v31, 16  ;;  %v600_v18 = vshrl.u32 %v2186_v31, 16  ;;  %v3150_v19 = vld [vmem:[#allocation2 + $0x10] sm:$0xf] }
  0x44   : > { %2482 = vmatpush3.bf16.msra.mxu0 %v2697_v50  ;;  %v467_v36 = vor.u32 %v465_v24, %v464_v28  ;;  %v468_v37 = vrot.slane %v464_v28, 4  ;;  %v472_v38 = vrot.slane %v470_v32, 7  ;;  %v3103_v40 = vld [vmem:[#allocation2 + $0x30] sm:$0xf]  ;;  %v738_v41 = vld [vmem:[#allocation2 + $0x34] sm:$0x1] }
  0x45   : > { %2483 = vmatprep.subr.bf16.mxu0 %v2699_v63  ;;  %v534_v43 = vld [vmem:[#allocation2 + $0x3c] sm:$0x1]  ;;  %v2199_v44 = vcombine.low %v3103_v40, %v738_v41  ;;  %v2719_v57 = vld [vmem:[%s3386_s3 + $0x8] sm:$0xff]   ;;  %v609_v14 = vshll.u32 %v2187_v8, 16  ;;  %v548_v20 = vld [vmem:[#allocation2 + $0x14] sm:$0x1] }
  0x46   : > { %2612 = vmatpush3.bf16.msra.mxu1 %v2702_v11  ;;  %v475_v46 = vor.u32 %v473_v33, %v472_v38  ;;  %v476_v47 = vrot.slane %v472_v38, 4  ;;  %v532_v52 = vsel %vm2979_vm6, %v467_v36, %v531_v16  ;;  %v535_v58 = vsel %vm2926_vm2, %v468_v37, %v534_v43  ;;  %v3154_v23 = vld [vmem:[#allocation2 + $0x18] sm:$0xf] }
  0x47   : > { %1121 = vmatmul.mubr.bf16.gmra.mxu0 %v2253_v29  ;;  %2613 = vmatprep.subr.bf16.mxu1 %v2705_v21  ;;  %v819_v54 = vshrl.u32 %v2199_v44, 16  ;;  %v821_v55 = vshll.u32 %v2199_v44, 16  ;;  %v844_v56 = vrot.slane %v2199_v44, 1  ;;  %533 = vst [vmem:[#allocation2 + $0x38] sm:$0xf] %v532_v52  ;;  %v2256_v11 = vcombine.low %v3101_v7, %v3103_v40  ;;  %v2726_v40 = vld [vmem:[%s3386_s3 + $0x1f8] sm:$0xff]  }
  0x48   : > { %2484 = vmatpush3.bf16.msra.mxu0 %v2701_v30  ;;  %v736_v29 = vld [vmem:[#allocation2 + $0x2c] sm:$0x1]  ;;  %536 = vst [vmem:[#allocation2 + $0x3c] sm:$0x1] %v535_v58  ;;  %v538_v62 = vsel %vm2979_vm6, %v475_v46, %v537_v39  ;;  %v541_v63 = vsel %vm2926_vm2, %v476_v47, %v540_v48  ;;  %v655_v30 = vrot.slane %v2186_v31, 1  ;;  %v656_v22 = vrot.slane %v2187_v8, 1 }
  0x49   : > { %2485 = vmatprep.subr.bf16.mxu0 %v2703_v35  ;;  %v2198_v42 = vcombine.low %v3101_v7, %v736_v29  ;;  %v823_v3 = vrot.slane %v821_v55, 1  ;;  %539 = vst [vmem:[#allocation2 + $0x40] sm:$0xf] %v538_v62  ;;  %542 = vst [vmem:[#allocation2 + $0x44] sm:$0x1] %v541_v63  ;;  %v611_v7 = vrot.slane %v609_v14, 1  ;;  %v2188_v16 = vcombine.low %v3150_v19, %v548_v20 }
  0x4a   : > { %2614 = vmatpush3.bf16.msra.mxu1 %v2705_v21  ;;  %v607_v21 = vshrl.u32 %v2187_v8, 16  ;;  %v2729_v44 = vld [vmem:[%s3386_s3 + $0x238] sm:$0xff]   ;;  %v2288_v47 = vcombine.low %v655_v30, %v656_v22  ;;  %v554_v31 = vld [vmem:[#allocation2 + $0x2c] sm:$0x1]  ;;  %v2286_v30 = vcombine.low %v3120_v60, %v3129_v2  ;;  %v2732_v20 = vld [vmem:[%s3386_s3 + $0x1f0] sm:$0xff]  }
  0x4b   : > { %v812_v49 = vshrl.u32 %v2198_v42, 16  ;;  %v814_v50 = vshll.u32 %v2198_v42, 16  ;;  %v843_v51 = vrot.slane %v2198_v42, 1  ;;  %2615 = vmatprep.subr.bf16.mxu1 %v2713_v34  ;;  %v824_v10 = vor.u32 %v823_v3, %v819_v54  ;;  %v3169_v3 = vld [vmem:[#allocation2 + $0x20] sm:$0xf] }
  0x4c   : > { %2486 = vmatpush3.bf16.msra.mxu0 %v2704_v25  ;;  %v2722_v25 = vld [vmem:[%s3386_s3] sm:$0xff]   ;;  %v616_v48 = vshll.u32 %v2188_v16, 16  ;;  %v657_v54 = vrot.slane %v2188_v16, 1  ;;  %v614_v58 = vshrl.u32 %v2188_v16, 16 }
  0x4d   : > { %2487 = vmatprep.subr.bf16.mxu0 %v2708_v27  ;;  %v816_v61 = vrot.slane %v814_v50, 1  ;;  %v2258_v4 = vcombine.low %v843_v51, %v844_v56  ;;  %v550_v27 = vld [vmem:[#allocation2 + $0x1c] sm:$0x1]  ;;  %v612_v51 = vor.u32 %v611_v7, %v607_v21  ;;  %v2733_v7 = vld [vmem:[%s3386_s3 + $0x1b0] sm:$0xff]  }
  0x4e   : > { %2616 = vmatpush3.bf16.msra.mxu1 %v2713_v34  ;;  %v3152_v35 = vld [vmem:[#allocation2 + $0x38] sm:$0xf]  ;;  %v604_v34 = vrot.slane %v602_v13, 1  ;;  %v2189_v36 = vcombine.low %v3154_v23, %v550_v27  ;;  %v556_v27 = vld [vmem:[#allocation2 + $0x34] sm:$0x1] }
  0x4f   : > { %v817_v6 = vor.u32 %v816_v61, %v812_v49  ;;  %2603 = vmatprep.mubr.bf16.mxu1 %v2258_v4  ;;  %2617 = vmatprep.subr.bf16.mxu1 %v2716_v59  ;;  %v740_v24 = vld [vmem:[#allocation2 + $0x3c] sm:$0x1]  ;;  %v552_v4 = vld [vmem:[#allocation2 + $0x24] sm:$0x1] }
  0x50   : > { %2488 = vmatpush3.bf16.msra.mxu0 %v2710_v45  ;;  %v741_v28 = vld [vmem:[#allocation2 + $0x40] sm:$0xf]  ;;  %v742_v32 = vld [vmem:[#allocation2 + $0x44] sm:$0x1]  ;;  %v2200_v33 = vcombine.low %v3152_v35, %v740_v24  ;;  %v605_v46 = vor.u32 %v604_v34, %v600_v18  ;;  %v623_v52 = vshll.u32 %v2189_v36, 16  ;;  %v658_v55 = vrot.slane %v2189_v36, 1 }
  0x51   : > { %2489 = vmatprep.subr.bf16.mxu0 %v2714_v53  ;;  %v2257_v15 = vcombine.low %v817_v6, %v824_v10  ;;  %v2201_v29 = vcombine.low %v741_v28, %v742_v32  ;;  %v2259_v61 = vcombine.low %v3152_v35, %v741_v28  ;;  %v2190_v6 = vcombine.low %v3169_v3, %v552_v4  ;;  %v2734_v10 = vld [vmem:[%s3386_s3 + $0x230] sm:$0xff]   ;;  %v2738_v35 = vld [vmem:[%s3386_s3 + $0x228] sm:$0xff]   ;;  %v3191_v32 = vld [vmem:[#allocation2 + $0x38] sm:$0xf] }
  0x52   : > { %2618 = vmatpush3.bf16.msra.mxu1 %v2716_v59  ;;  %v845_v37 = vrot.slane %v2200_v33, 1  ;;  %v826_v38 = vshrl.u32 %v2200_v33, 16  ;;  %v828_v39 = vshll.u32 %v2200_v33, 16  ;;  %v621_v59 = vshrl.u32 %v2189_v36, 16  ;;  %v558_v60 = vld [vmem:[#allocation2 + $0x3c] sm:$0x1] }
  0x53   : > { %1128 = vmatprep.mubr.bf16.mxu0 %v2257_v15  ;;  %2619 = vmatprep.subr.bf16.mxu1 %v2720_v26  ;;  %v846_v41 = vrot.slane %v2201_v29, 1  ;;  %v833_v42 = vshrl.u32 %v2201_v29, 16  ;;  %v835_v43 = vshll.u32 %v2201_v29, 16  ;;  %v2287_v63 = vcombine.low %v605_v46, %v612_v51  ;;  %v2728_v15 = vld [vmem:[%s3386_s3 + $0x1b8] sm:$0xff]   ;;  %v2739_v46 = vld [vmem:[%s3386_s3 + $0x1e0] sm:$0xff]  }
  0x54   : > { %2490 = vmatpush3.bf16.msra.mxu0 %v2715_v0  ;;  %v830_v45 = vrot.slane %v828_v39, 1  ;;  %v618_v0 = vrot.slane %v616_v48, 1  ;;  %v625_v1 = vrot.slane %v623_v52, 1  ;;  %v2291_v5 = vcombine.low %v657_v54, %v658_v55  ;;  %v3215_v51 = vld [vmem:[#allocation2 + $0x10] sm:$0xf]  ;;  %v2740_v54 = vld [vmem:[%s3386_s3 + $0x1a0] sm:$0xff]  }
  0x55   : > { %2491 = vmatprep.subr.bf16.mxu0 %v2717_v9  ;;  %1129 = vmatmul.mubr.bf16.gmra.mxu0 %v2256_v11  ;;  %v2261_v49 = vcombine.low %v845_v37, %v846_v41  ;;  %v837_v50 = vrot.slane %v835_v43, 1  ;;  %v3171_v9 = vld [vmem:[#allocation2 + $0x28] sm:$0xf]  ;;  %v659_v13 = vrot.slane %v2190_v6, 1  ;;  %v2193_v33 = vcombine.low %v3191_v32, %v558_v60  ;;  %v2741_v37 = vld [vmem:[%s3386_s3 + $0x220] sm:$0xff]   ;;  %v2744_v55 = vld [vmem:[%s3386_s3 + $0x1d8] sm:$0xff]  }
  0x56   : > { %2620 = vmatpush3.bf16.msra.mxu1 %v2720_v26  ;;  %v831_v53 = vor.u32 %v830_v45, %v826_v38  ;;  %v2191_v8 = vcombine.low %v3171_v9, %v554_v31  ;;  %v619_v26 = vor.u32 %v618_v0, %v614_v58  ;;  %v626_v11 = vor.u32 %v625_v1, %v621_v59  ;;  %v1510_v52 = vld [vmem:[#allocation2 + $0x14] sm:$0x1]  ;;  %v3230_v0 = vld [vmem:[#allocation2 + $0x20] sm:$0xf]  ;;  %v1514_v1 = vld [vmem:[#allocation2 + $0x24] sm:$0x1] }
  0x57   : > { %2621 = vmatprep.subr.bf16.mxu1 %v2723_v17  ;;  %2604 = vmatmul.mubr.bf16.gmra.mxu1 %v2261_v49  ;;  %v838_v56 = vor.u32 %v837_v50, %v833_v42  ;;  %v662_v16 = vrot.slane %v2193_v33, 1  ;;  %v651_v36 = vshll.u32 %v2193_v33, 16  ;;  %v2737_v42 = vld [vmem:[%s3386_s3 + $0x1a8] sm:$0xff]   ;;  %v2289_v45 = vcombine.low %v3150_v19, %v3154_v23  ;;  %v2747_v50 = vld [vmem:[%s3386_s3 + $0x218] sm:$0xff]  }
  0x58   : > { %2492 = vmatpush3.bf16.msra.mxu0 %v2719_v57  ;;  %2623 = vmatprep.mubr.bf16.mxu1 %v2288_v47  ;;  %v630_v57 = vshll.u32 %v2190_v6, 16  ;;  %v660_v14 = vrot.slane %v2191_v8, 1  ;;  %v635_v18 = vshrl.u32 %v2191_v8, 16  ;;  %v2290_v28 = vcombine.low %v619_v26, %v626_v11  ;;  %v3217_v19 = vld [vmem:[#allocation2 + $0x18] sm:$0xf] }
  0x59   : > { %2493 = vmatprep.subr.bf16.mxu0 %v2721_v12  ;;  %v2260_v62 = vcombine.low %v831_v53, %v838_v56  ;;  %v637_v12 = vshll.u32 %v2191_v8, 16  ;;  %v653_v48 = vrot.slane %v651_v36, 1  ;;  %v1512_v23 = vld [vmem:[#allocation2 + $0x1c] sm:$0x1]  ;;  %v2322_v53 = vcombine.low %v3215_v51, %v1510_v52  ;;  %v2752_v56 = vld [vmem:[%s3386_s3 + $0x210] sm:$0xff]   ;;  %v2758_v52 = vld [vmem:[%s3386_s3 + $0x180] sm:$0xff]  }
  0x5a   : > { %2622 = vmatpush3.bf16.msra.mxu1 %v2723_v17  ;;  %v628_v17 = vshrl.u32 %v2190_v6, 16  ;;  %v632_v21 = vrot.slane %v630_v57, 1  ;;  %v2294_v24 = vcombine.low %v659_v13, %v660_v14  ;;  %v3232_v31 = vld [vmem:[#allocation2 + $0x28] sm:$0xf]  ;;  %v1516_v6 = vld [vmem:[#allocation2 + $0x2c] sm:$0x1]  ;;  %v2292_v8 = vcombine.low %v3169_v3, %v3171_v9 }
  0x5b   : > { %2631 = vmatprep.subr.bf16.mxu1 %v2729_v44  ;;  %1136 = vmatprep.mubr.bf16.mxu0 %v2260_v62  ;;  %v639_v22 = vrot.slane %v637_v12, 1  ;;  %v1568_v62 = vshll.u32 %v2322_v53, 16  ;;  %v1566_v26 = vshrl.u32 %v2322_v53, 16  ;;  %v2324_v57 = vcombine.low %v3230_v0, %v1514_v1  ;;  %v2746_v12 = vld [vmem:[%s3386_s3 + $0x198] sm:$0xff]   ;;  %v2748_v3 = vld [vmem:[%s3386_s3 + $0x1d0] sm:$0xff]   ;;  %v2756_v9 = vld [vmem:[%s3386_s3 + $0x208] sm:$0xff]  }
  0x5c   : > { %2494 = vmatpush3.bf16.msra.mxu0 %v2722_v25  ;;  %v3189_v25 = vld [vmem:[#allocation2 + $0x30] sm:$0xf]  ;;  %v633_v38 = vor.u32 %v632_v21, %v628_v17  ;;  %v2325_v17 = vcombine.low %v3232_v31, %v1516_v6  ;;  %v3262_v36 = vld [vmem:[#allocation2 + $0x40] sm:$0xf] }
  0x5d   : > { %2531 = vmatprep.subr.bf16.mxu0 %v2726_v40  ;;  %1137 = vmatmul.mubr.bf16.gmra.mxu0 %v2259_v61  ;;  %v2192_v2 = vcombine.low %v3189_v25, %v556_v27  ;;  %v640_v39 = vor.u32 %v639_v22, %v635_v18  ;;  %v2735_v40 = vld [vmem:[%s3386_s3 + $0x1e8] sm:$0xff]   ;;  %v2323_v61 = vcombine.low %v3217_v19, %v1512_v23  ;;  %v1570_v13 = vrot.slane %v1568_v62, 1  ;;  %v3247_v18 = vld [vmem:[#allocation2 + $0x30] sm:$0xf]  ;;  %v2759_v22 = vld [vmem:[%s3386_s3 + $0x200] sm:$0xff]  }
  0x5e   : > { %1410 = vmatprep.mubr.bf16.mxu0 %v2287_v63  ;;  %v1621_v63 = vrot.slane %v2322_v53, 1  ;;  %v2751_v21 = vld [vmem:[%s3386_s3 + $0x190] sm:$0xff]   ;;  %v1589_v60 = vshll.u32 %v2325_v17, 16 }
  0x5f   : > { %2624 = vmatmul.mubr.bf16.vlgmr.msra.gmra.mxu1 %v2291_v5  ;;  %v661_v34 = vrot.slane %v2192_v2, 1  ;;  %v644_v29 = vshll.u32 %v2192_v2, 16  ;;  %v642_v43 = vshrl.u32 %v2192_v2, 16  ;;  %v2293_v49 = vcombine.low %v633_v38, %v640_v39  ;;  %v2753_v2 = vld [vmem:[%s3386_s3 + $0x1c8] sm:$0xff]  }
  0x60   : > { %2632 = vmatpush3.bf16.msra.mxu1 %v2729_v44  ;;  %2627 = vmatprep.mubr.bf16.mxu1 %v2294_v24  ;;  %v649_v44 = vshrl.u32 %v2193_v33, 16  ;;  %v1575_v4 = vshll.u32 %v2323_v61, 16  ;;  %v1622_v5 = vrot.slane %v2323_v61, 1  ;;  %v1573_v14 = vshrl.u32 %v2323_v61, 16 }
  0x61   : > { %2633 = vmatprep.subr.bf16.mxu1 %v2734_v10  ;;  %v2297_v41 = vcombine.low %v661_v34, %v662_v16  ;;  %v646_v47 = vrot.slane %v644_v29, 1  ;;  %v1571_v24 = vor.u32 %v1570_v13, %v1566_v26  ;;  %v1623_v33 = vrot.slane %v2324_v57, 1 }
  0x62   : > { %v654_v59 = vor.u32 %v653_v48, %v649_v44  ;;  %v2380_v11 = vcombine.low %v1621_v63, %v1622_v5  ;;  %v1624_v16 = vrot.slane %v2325_v17, 1  ;;  %v1580_v29 = vshrl.u32 %v2324_v57, 16 }
  0x63   : > { %v647_v58 = vor.u32 %v646_v47, %v642_v43  ;;  %v2295_v38 = vcombine.low %v3189_v25, %v3191_v32  ;;  %v2755_v43 = vld [vmem:[%s3386_s3 + $0x188] sm:$0xff]   ;;  %v1591_v47 = vrot.slane %v1589_v60, 1  ;;  %v2757_v25 = vld [vmem:[%s3386_s3 + $0x1c0] sm:$0xff]  }
  0x64   : > { %2634 = vmatpush3.bf16.msra.mxu1 %v2734_v10  ;;  %v2383_v32 = vcombine.low %v1623_v33, %v1624_v16 }
  0x65   : > { %1411 = vmatmul.mubr.bf16.vlgmr.msra.gmra.mxu0 %v2286_v30  ;;  %2635 = vmatprep.subr.bf16.mxu1 %v2738_v35  ;;  %v2296_v10 = vcombine.low %v647_v58, %v654_v59  ;;  %v1518_v30 = vld [vmem:[#allocation2 + $0x34] sm:$0x1]  ;;  %v2378_v59 = vcombine.low %v3215_v51, %v3217_v19 }
  0x66   : > { %2532 = vmatpush3.bf16.msra.mxu0 %v2728_v15  ;;  %1418 = vmatprep.mubr.bf16.mxu0 %v2290_v28  ;;  %v1577_v15 = vrot.slane %v1575_v4, 1  ;;  %v1582_v28 = vshll.u32 %v2324_v57, 16  ;;  %v2326_v34 = vcombine.low %v3247_v18, %v1518_v30 }
  0x67   : > { %2533 = vmatprep.subr.bf16.mxu0 %v2732_v20  ;;  %2628 = vmatmul.mubr.bf16.gmra.mxu1 %v2297_v41  ;;  %v3249_v20 = vld [vmem:[#allocation2 + $0x38] sm:$0xf]  ;;  %v1523_v41 = vld [vmem:[#allocation2 + $0x48] sm:$0xf] }
  0x68   : > { %2636 = vmatpush3.bf16.msra.mxu1 %v2738_v35  ;;  %2647 = vmatprep.mubr.bf16.mxu1 %v2380_v11  ;;  %v1520_v35 = vld [vmem:[#allocation2 + $0x3c] sm:$0x1]  ;;  %v1578_v27 = vor.u32 %v1577_v15, %v1573_v14  ;;  %v1625_v39 = vrot.slane %v2326_v34, 1  ;;  %v1594_v61 = vshrl.u32 %v2326_v34, 16  ;;  %v2381_v11 = vcombine.low %v3230_v0, %v3232_v31 }
  0x69   : > { %2637 = vmatprep.subr.bf16.mxu1 %v2741_v37 }
  0x6a   : > { %2534 = vmatpush3.bf16.msra.mxu0 %v2733_v7  ;;  %v2327_v7 = vcombine.low %v3249_v20, %v1520_v35  ;;  %v2379_v44 = vcombine.low %v1571_v24, %v1578_v27 }
  0x6b   : > { %2535 = vmatprep.subr.bf16.mxu0 %v2735_v40 }
  0x6c   : > { %2638 = vmatpush3.bf16.msra.mxu1 %v2741_v37  ;;  %v1522_v37 = vld [vmem:[#allocation2 + $0x44] sm:$0x1]  ;;  %v1626_v40 = vrot.slane %v2327_v7, 1  ;;  %v1601_v1 = vshrl.u32 %v2327_v7, 16 }
  0x6d   : > { %1419 = vmatmul.mubr.bf16.gmra.mxu0 %v2289_v45  ;;  %2639 = vmatprep.subr.bf16.mxu1 %v2747_v50  ;;  %v1584_v45 = vrot.slane %v1582_v28, 1  ;;  %v2328_v48 = vcombine.low %v3262_v36, %v1522_v37 }
  0x6e   : > { %2536 = vmatpush3.bf16.msra.mxu0 %v2737_v42  ;;  %1426 = vmatprep.mubr.bf16.mxu0 %v2293_v49  ;;  %v1524_v42 = vld [vmem:[#allocation2 + $0x4c] sm:$0x1] }
  0x6f   : > { %2537 = vmatprep.subr.bf16.mxu0 %v2739_v46  ;;  %v1587_v46 = vshrl.u32 %v2325_v17, 16  ;;  %v2329_v49 = vcombine.low %v1523_v41, %v1524_v42  ;;  %v1585_v23 = vor.u32 %v1584_v45, %v1580_v29  ;;  %v1608_v57 = vshrl.u32 %v2328_v48, 16 }
  0x70   : > { %2640 = vmatpush3.bf16.msra.mxu1 %v2747_v50  ;;  %v2386_v50 = vcombine.low %v1625_v39, %v1626_v40  ;;  %v2384_v17 = vcombine.low %v3247_v18, %v3249_v20 }
  0x71   : > { %2641 = vmatprep.subr.bf16.mxu1 %v2752_v56  ;;  %v1592_v53 = vor.u32 %v1591_v47, %v1587_v46  ;;  %v1628_v58 = vrot.slane %v2329_v49, 1  ;;  %v1617_v26 = vshll.u32 %v2329_v49, 16 }
  0x72   : > { %2538 = vmatpush3.bf16.msra.mxu0 %v2740_v54  ;;  %v1596_v54 = vshll.u32 %v2326_v34, 16 }
  0x73   : > { %2539 = vmatprep.subr.bf16.mxu0 %v2744_v55  ;;  %v1603_v55 = vshll.u32 %v2327_v7, 16  ;;  %v2382_v62 = vcombine.low %v1585_v23, %v1592_v53  ;;  %v1619_v13 = vrot.slane %v1617_v26, 1 }
  0x74   : > { %2642 = vmatpush3.bf16.msra.mxu1 %v2752_v56  ;;  %v1627_v56 = vrot.slane %v2328_v48, 1  ;;  %v1598_v63 = vrot.slane %v1596_v54, 1 }
  0x75   : > { %1427 = vmatmul.mubr.bf16.gmra.mxu0 %v2292_v8  ;;  %2643 = vmatprep.subr.bf16.mxu1 %v2756_v9  ;;  %v1605_v4 = vrot.slane %v1603_v55, 1 }
  0x76   : > { %2540 = vmatpush3.bf16.msra.mxu0 %v2746_v12  ;;  %1434 = vmatprep.mubr.bf16.mxu0 %v2296_v10  ;;  %v2389_v5 = vcombine.low %v1627_v56, %v1628_v58  ;;  %v1599_v6 = vor.u32 %v1598_v63, %v1594_v61  ;;  %v1610_v10 = vshll.u32 %v2328_v48, 16  ;;  %v1615_v12 = vshrl.u32 %v2329_v49, 16 }
  0x77   : > { %2541 = vmatprep.subr.bf16.mxu0 %v2748_v3  ;;  %v1606_v8 = vor.u32 %v1605_v4, %v1601_v1 }
  0x78   : > { %2644 = vmatpush3.bf16.msra.mxu1 %v2756_v9  ;;  %v1612_v19 = vrot.slane %v1610_v10, 1  ;;  %v1620_v15 = vor.u32 %v1619_v13, %v1615_v12  ;;  %v2387_v9 = vcombine.low %v3262_v36, %v1523_v41 }
  0x79   : > { %2645 = vmatprep.subr.bf16.mxu1 %v2759_v22  ;;  %v2385_v51 = vcombine.low %v1599_v6, %v1606_v8 }
  0x7a   : > { %2542 = vmatpush3.bf16.msra.mxu0 %v2751_v21  ;;  %v1613_v14 = vor.u32 %v1612_v19, %v1608_v57 }
  0x7b   : > { %2543 = vmatprep.subr.bf16.mxu0 %v2753_v2 }
  0x7c   : > { %2646 = vmatpush3.bf16.msra.mxu1 %v2759_v22  ;;  %v2388_v3 = vcombine.low %v1613_v14, %v1620_v15 }
  0x7d   : > { %1435 = vmatmul.mubr.bf16.gmra.mxu0 %v2295_v38 }
  0x7e   : > { %2544 = vmatpush3.bf16.msra.mxu0 %v2755_v43  ;;  %1894 = vmatprep.mubr.bf16.mxu0 %v2379_v44 }
  0x7f   : > { %2545 = vmatprep.subr.bf16.mxu0 %v2757_v25  ;;  %2648 = vmatmul.mubr.bf16.vlgmr.msra.gmra.mxu1 %v2383_v32 }
  0x80   : > { %2651 = vmatprep.mubr.bf16.mxu1 %v2386_v50 }
  0x82   : > { %2546 = vmatpush3.bf16.msra.mxu0 %v2758_v52 }
  0x85   : > { %1895 = vmatmul.mubr.bf16.vlgmr.msra.gmra.mxu0 %v2378_v59 }
  0x86   : > { %1902 = vmatprep.mubr.bf16.mxu0 %v2382_v62 }
  0x87   : > { %2652 = vmatmul.mubr.bf16.gmra.mxu1 %v2389_v5 }
  0x8d   : > { %1903 = vmatmul.mubr.bf16.gmra.mxu0 %v2381_v11 }
  0x8e   : > { %1910 = vmatprep.mubr.bf16.mxu0 %v2385_v51 }
  0x95   : > { %1911 = vmatmul.mubr.bf16.gmra.mxu0 %v2384_v17 }
  0x96   : > { %1918 = vmatprep.mubr.bf16.mxu0 %v2388_v3 }
  0x9d   : > { %1919 = vmatmul.mubr.bf16.gmra.mxu0 %v2387_v9 }
  0xfd   : > { %v3285_v27 = vpop.f32.mrf.mxu1 }
  0xff   : > { %v2443_v30 = vpop.f32.mrf.mxu0  ;;  %v1179_v60 = vpop.f32.mrf.mxu1 }
 0x101   : > { %v2444_v0 = vpop.f32.mrf.mxu0  ;;  %v3291_v20 = vpop.f32.mrf.mxu1 }
 0x102   : > { %v2445_v1 = vadd.f32 %v2444_v0, %v2443_v30 }
 0x103   : > { %v2446_v31 = vpop.f32.mrf.mxu0  ;;  %v1182_v34 = vpop.f32.mrf.mxu1 }
 0x104   : > { %v1180_v26 = vadd.f32 %v2445_v1, %v1179_v60 }
 0x105   : > { %v2447_v35 = vpop.f32.mrf.mxu0 }
 0x106   : > { %v2448_v11 = vadd.f32 %v2447_v35, %v2446_v31 }
 0x107   : > { %v2449_v21 = vpop.f32.mrf.mxu0 }
 0x108   : > { %v1183_v14 = vadd.f32 %v2448_v11, %v1182_v34 }
 0x109   : > { %v2450_v22 = vpop.f32.mrf.mxu0 }
 0x10a   : > { %v2451_v15 = vadd.f32 %v2450_v22, %v2449_v21 }
 0x10b   : > { %v3283_v24 = vpop.f32.mrf.mxu0 }
 0x10c   : > { %v1188_v60 = vadd.f32 %v3285_v27, %v2451_v15 }
 0x10d   : > { %v3287_v28 = vpop.f32.mrf.mxu0 }
 0x10e   : > { %v2454_v34 = vadd.f32 %v3287_v28, %v3283_v24 }
 0x115   : > { %v3289_v18 = vpop.f32.mrf.mxu0 }
 0x117   : > { %v3293_v2 = vpop.f32.mrf.mxu0  ;;  %v3297_v7 = vpop.f32.mrf.mxu1 }
 0x118   : > { %v2457_v1 = vadd.f32 %v3293_v2, %v3289_v18 }
 0x119   : > { %v3295_v33 = vpop.f32.mrf.mxu0  ;;  %v3301_v29 = vpop.f32.mrf.mxu1 }
 0x11b   : > { %v3299_v16 = vpop.f32.mrf.mxu0  ;;  %v3305_v37 = vpop.f32.mrf.mxu1 }
 0x11d   : > { %v3303_v36 = vpop.f32.mrf.mxu0  ;;  %v3311_v40 = vpop.f32.mrf.mxu1 }
 0x11f   : > { %v3307_v38 = vpop.f32.mrf.mxu0  ;;  %v3315_v42 = vpop.f32.mrf.mxu1 }
 0x121   : > { %v3309_v39 = vpop.f32.mrf.mxu0  ;;  %v1477_v45 = vpop.f32.mrf.mxu1 }
 0x123   : > { %v3313_v41 = vpop.f32.mrf.mxu0  ;;  %v3317_v25 = vpop.f32.mrf.mxu1 }
 0x125   : > { %v2495_v43 = vpop.f32.mrf.mxu0  ;;  %v1480_v49 = vpop.f32.mrf.mxu1 }
 0x127   : > { %v2496_v44 = vpop.f32.mrf.mxu0  ;;  %v3319_v52 = vpop.f32.mrf.mxu1 }
 0x128   : > { %v2497_v6 = vadd.f32 %v2496_v44, %v2495_v43 }
 0x129   : > { %v2498_v46 = vpop.f32.mrf.mxu0  ;;  %v3321_v54 = vpop.f32.mrf.mxu1 }
 0x12a   : > { %v1413_v19 = vadd.f32 %v2497_v6, %v1180_v26 }
 0x12b   : > { %v2499_v47 = vpop.f32.mrf.mxu0  ;;  %v3323_v58 = vpop.f32.mrf.mxu1 }
 0x12c   : > { %3396 = vst [vmem:[#allocation3_spill] sm:$0xff] %v3323_v58  ;;  %v2500_v51 = vadd.f32 %v2499_v47, %v2498_v46  ;;  %v1478_v9 = vadd.f32 %v1477_v45, %v1413_v19 }
 0x12d   : > { %v2501_v32 = vpop.f32.mrf.mxu0  ;;  %v3327_v62 = vpop.f32.mrf.mxu1 }
 0x12e   : > { %v1416_v0 = vadd.f32 %v2500_v51, %v1183_v14 }
 0x12f   : > { %v2502_v48 = vpop.f32.mrf.mxu0 }
 0x130   : > { %v2503_v30 = vadd.f32 %v2502_v48, %v2501_v32  ;;  %v1481_v45 = vadd.f32 %v1480_v49, %v1416_v0  ;;  %v1191_v48 = vadd.f32 %v3291_v20, %v2454_v34  ;;  %v2460_v20 = vadd.f32 %v3299_v16, %v3295_v33 }
 0x131   : > { %v2504_v50 = vpop.f32.mrf.mxu0 }
 0x132   : > { %v1421_v44 = vadd.f32 %v2503_v30, %v1188_v60 }
 0x133   : > { %v2505_v23 = vpop.f32.mrf.mxu0 }
 0x134   : > { %v2506_v46 = vadd.f32 %v2505_v23, %v2504_v50  ;;  %v1486_v24 = vadd.f32 %v3315_v42, %v1421_v44  ;;  %v1196_v23 = vadd.f32 %v2457_v1, %v3301_v29  ;;  %v2463_v29 = vadd.f32 %v3307_v38, %v3303_v36 }
 0x135   : > { %v2507_v53 = vpop.f32.mrf.mxu0 }
 0x136   : > { %v1424_v28 = vadd.f32 %v2506_v46, %v1191_v48  ;;  %v1204_v36 = vadd.f32 %v3297_v7, %v2463_v29 }
 0x137   : > { %v2508_v55 = vpop.f32.mrf.mxu0 }
 0x138   : > { %v1489_v51 = vadd.f32 %v3317_v25, %v1424_v28 }
 0x139   : > { %v2510_v56 = vpop.f32.mrf.mxu0 }
 0x13b   : > { %v2511_v59 = vpop.f32.mrf.mxu0 }
 0x13c   : > { %v2512_v19 = vadd.f32 %v2511_v59, %v2510_v56  ;;  %v2466_v59 = vadd.f32 %v3313_v41, %v3309_v39 }
 0x13d   : > { %v3325_v61 = vpop.f32.mrf.mxu0 }
 0x13e   : > { %v1207_v41 = vadd.f32 %v3305_v37, %v2466_v59 }
 0x13f   : > { %v3329_v63 = vpop.f32.mrf.mxu0  ;;  %v2649_v4 = vpop.f32.mrf.mxu1 }
 0x141   : > { %v3331_v5 = vpop.f32.mrf.mxu0  ;;  %v1961_v10 = vpop.f32.mrf.mxu1 }
 0x143   : > { %v3333_v8 = vpop.f32.mrf.mxu0  ;;  %v2650_v13 = vpop.f32.mrf.mxu1 }
 0x145   : > { %v2547_v57 = vpop.f32.mrf.mxu0  ;;  %v1964_v35 = vpop.f32.mrf.mxu1 }
 0x147   : > { %v2548_v12 = vpop.f32.mrf.mxu0  ;;  %v2653_v26 = vpop.f32.mrf.mxu1 }
 0x148   : > { %v2549_v17 = vadd.f32 %v2548_v12, %v2547_v57 }
 0x149   : > { %v2550_v3 = vpop.f32.mrf.mxu0  ;;  %v1977_v2 = vpop.f32.mrf.mxu1 }
 0x14a   : > { %v1962_v58 = vadd.f32 %v2549_v17, %v1961_v10  ;;  %v2515_v17 = vadd.f32 %v3329_v63, %v3325_v61 }
 0x14b   : > { %v2551_v31 = vpop.f32.mrf.mxu0  ;;  %v2654_v16 = vpop.f32.mrf.mxu1 }
 0x14c   : > { %v1992_v21 = vadd.f32 %v1962_v58, %v1478_v9  ;;  %v2552_v22 = vadd.f32 %v2551_v31, %v2550_v3  ;;  %v2509_v58 = vadd.f32 %v2508_v55, %v2507_v53  ;;  %v1199_v55 = vadd.f32 %v2460_v20, %v3311_v40 }
 0x14d   : > { %v2553_v43 = vpop.f32.mrf.mxu0  ;;  %v2518_v9 = vadd.f32 %v3333_v8, %v3331_v5  ;;  %v1980_v0 = vpop.f32.mrf.mxu1  ;;  %v1437_v63 = vadd.f32 %v2515_v17, %v1204_v36 }
 0x14e   : > { %2000 = vst [vmem:[%s3339_s7] sm:$0xff] %v1992_v21  ;;  %v1965_v47 = vadd.f32 %v2552_v22, %v1964_v35  ;;  %v1429_v12 = vadd.f32 %v2509_v58, %v1196_v23  ;;  %v1432_v25 = vadd.f32 %v2512_v19, %v1199_v55 }
 0x14f   : > { %v2554_v32 = vpop.f32.mrf.mxu0  ;;  %v1440_v5 = vadd.f32 %v2518_v9, %v1207_v41  ;;  %v1502_v46 = vadd.f32 %v3319_v52, %v1437_v63 }
 0x150   : > { %v1993_v6 = vadd.f32 %v1965_v47, %v1481_v45  ;;  %v2555_v27 = vadd.f32 %v2554_v32, %v2553_v43  ;;  %v1494_v15 = vadd.f32 %v3321_v54, %v1429_v12  ;;  %v2021_v54 = vmul.f32 %v1992_v21, %v1992_v21 }
 0x151   : > { %v2556_v10 = vpop.f32.mrf.mxu0  ;;  %v1497_v31 = vadd.f32 %v3327_v62, %v1432_v25 }
 0x152   : > { %2001 = vst [vmem:[%s3339_s7 + $0x8] sm:$0xff] %v1993_v6  ;;  %v1970_v49 = vadd.f32 %v2649_v4, %v2555_v27  ;;  %v2022_v40 = vmul.f32 %v1993_v6, %v1993_v6  ;;  %v2008_v35 = vadd.f32 %v1993_v6, %v1992_v21 }
 0x153   : > { %v2557_v50 = vpop.f32.mrf.mxu0 }
 0x154   : > { %v1994_v11 = vadd.f32 %v1970_v49, %v1486_v24  ;;  %v2558_v57 = vadd.f32 %v2557_v50, %v2556_v10  ;;  %v2029_v60 = vadd.f32 %v2022_v40, %v2021_v54  ;;  %v3397_v10 = vld [vmem:[#allocation3_spill] sm:$0xff] }
 0x155   : > { %v2559_v18 = vpop.f32.mrf.mxu0  ;;  %v1505_v24 = vadd.f32 %v3397_v10, %v1440_v5 }
 0x156   : > { %2002 = vst [vmem:[%s3339_s7 + $0x10] sm:$0xff] %v1994_v11  ;;  %v1973_v42 = vadd.f32 %v2650_v13, %v2558_v57  ;;  %v2023_v30 = vmul.f32 %v1994_v11, %v1994_v11  ;;  %v2009_v22 = vadd.f32 %v2008_v35, %v1994_v11 }
 0x157   : > { %v2560_v53 = vpop.f32.mrf.mxu0 }
 0x158   : > { %v1995_v4 = vadd.f32 %v1973_v42, %v1489_v51  ;;  %v2561_v14 = vadd.f32 %v2560_v53, %v2559_v18  ;;  %v2030_v8 = vadd.f32 %v2029_v60, %v2023_v30 }
 0x159   : > { %v2562_v33 = vpop.f32.mrf.mxu0 }
 0x15a   : > { %2003 = vst [vmem:[%s3339_s7 + $0x18] sm:$0xff] %v1995_v4  ;;  %v1978_v56 = vadd.f32 %v2561_v14, %v1977_v2  ;;  %v2024_v7 = vmul.f32 %v1995_v4, %v1995_v4  ;;  %v2010_v47 = vadd.f32 %v2009_v22, %v1995_v4 }
 0x15b   : > { %v2563_v13 = vpop.f32.mrf.mxu0 }
 0x15c   : > { %v1996_v38 = vadd.f32 %v1978_v56, %v1494_v15  ;;  %v2564_v3 = vadd.f32 %v2563_v13, %v2562_v33  ;;  %v2031_v32 = vadd.f32 %v2030_v8, %v2024_v7 }
 0x15d   : > { %v2565_v61 = vpop.f32.mrf.mxu0 }
 0x15e   : > { %2004 = vst [vmem:[%s3339_s7 + $0x20] sm:$0xff] %v1996_v38  ;;  %v1981_v39 = vadd.f32 %v2564_v3, %v1980_v0  ;;  %v2025_v62 = vmul.f32 %v1996_v38, %v1996_v38  ;;  %v2011_v37 = vadd.f32 %v2010_v47, %v1996_v38 }
 0x15f   : > { %v2566_v34 = vpop.f32.mrf.mxu0 }
 0x160   : > { %v1997_v43 = vadd.f32 %v1981_v39, %v1497_v31  ;;  %v2567_v44 = vadd.f32 %v2566_v34, %v2565_v61  ;;  %v2032_v28 = vadd.f32 %v2031_v32, %v2025_v62 }
 0x161   : > { %v2568_v45 = vpop.f32.mrf.mxu0 }
 0x162   : > { %2005 = vst [vmem:[%s3339_s7 + $0x28] sm:$0xff] %v1997_v43  ;;  %v1986_v21 = vadd.f32 %v2653_v26, %v2567_v44  ;;  %v2026_v1 = vmul.f32 %v1997_v43, %v1997_v43  ;;  %v2012_v58 = vadd.f32 %v2011_v37, %v1997_v43 }
 0x163   : > { %v2569_v48 = vpop.f32.mrf.mxu0 }
 0x164   : > { %v1998_v6 = vadd.f32 %v1986_v21, %v1502_v46  ;;  %v2570_v27 = vadd.f32 %v2569_v48, %v2568_v45  ;;  %v2033_v23 = vadd.f32 %v2032_v28, %v2026_v1 }
 0x166   : > { %2006 = vst [vmem:[%s3339_s7 + $0x30] sm:$0xff] %v1998_v6  ;;  %v2027_v49 = vmul.f32 %v1998_v6, %v1998_v6  ;;  %v1989_v50 = vadd.f32 %v2654_v16, %v2570_v27  ;;  %v2013_v52 = vadd.f32 %v2012_v58, %v1998_v6 }
 0x168   : > { %v1999_v20 = vadd.f32 %v1989_v50, %v1505_v24  ;;  %v2034_v11 = vadd.f32 %v2033_v23, %v2027_v49 }
 0x16a   : > { %2007 = vst [vmem:[%s3339_s7 + $0x38] sm:$0xff] %v1999_v20  ;;  %v2014_v26 = vadd.f32 %v2013_v52, %v1999_v20  ;;  %v2028_v57 = vmul.f32 %v1999_v20, %v1999_v20 }
 0x16c   : > { %v2015_v18 = vrot.slane %v2014_v26, 4  ;;  %v2035_v2 = vadd.f32 %v2034_v11, %v2028_v57 }
 0x16e   : > { %v2016_v51 = vadd.f32 %v2015_v18, %v2014_v26  ;;  %v2036_v19 = vrot.slane %v2035_v2, 4 }
 0x170   : > { %v2017_v12 = vrot.slane %v2016_v51, 2  ;;  %v2037_v42 = vadd.f32 %v2036_v19, %v2035_v2 }
 0x172   : > { %v2018_v53 = vadd.f32 %v2017_v12, %v2016_v51  ;;  %v2038_v55 = vrot.slane %v2037_v42, 2 }
 0x174   : > { %v2019_v29 = vrot.slane %v2018_v53, 1  ;;  %v2039_v4 = vadd.f32 %v2038_v55, %v2037_v42 }
 0x176   : > { %v2040_v14 = vrot.slane %v2039_v4, 1  ;;  %v2020_v33 = vadd.f32 %v2019_v29, %v2018_v53 }
 0x178   : > { %v2041_v16 = vadd.f32 %v2040_v14, %v2039_v4 }
 0x17a   : > { %v2043_v15 = vsel %vm360_vm0, %v2020_v33, %v2041_v16 }
 0x17b   : > { %2044 = vst [vmem:[%s274_s10] sm:$0x3] %v2043_v15 }
 0x17c PF: > { %s17_s21 = sadd.s32 1, %s2778_s21  }
 0x17d   : > { %p14_p4 = scmp.ge.s32.totalorder %s17_s21, 4  }
 0x17f   :  { %16 = sbr.rel (!%p14_p4) target bundleno = 1 (0x1), region = 95 }

</bundles_post_ra>
